<compile_context>
chip_gen: v6e
topology: v6e:2x2x1
jax: 0.10.0
libtpu: 0.0.40
codegen_flags: <defaults>
</compile_context>

<pallas_src>
import jax
import jax.numpy as jnp
from jax.experimental import pallas as pl
from jax.experimental.pallas import tpu as pltpu


# ----------------------------------------------------------------------------
# Fused Pallas kernel: embedding gather + L stacked LSTM layers + linear head.
# ----------------------------------------------------------------------------
def fused_lstm_head(ids_flat, embed_proj, w_hh0_t, b0, layer_ws,
                    h0_all, c0_all, w_l1, b_l1):
    """Fused embedding-gather + multi-layer LSTM + linear + sigmoid head.

    ids_flat   : (T*B, 1) int32 time-major token ids (row t*B + b).
    embed_proj : (V, 4H) embedding table pre-multiplied by W_ih0^T.
    w_hh0_t    : (H, 4H) layer-0 recurrent weight, transposed.
    b0         : (1, 4H) layer-0 combined bias (b_ih + b_hh).
    layer_ws   : per layer 1..L-1: (W_ih^T (H,4H), W_hh^T (H,4H), bias (1,4H)).
    h0_all, c0_all : (L, B, H) initial hidden / cell states.
    w_l1 : (O, H) head weight (PyTorch layout); b_l1 : (1, O) head bias.
    Returns sigmoid(last_h @ w_l1^T + b_l1) of shape (B, O), float32.
    """
    TB = ids_flat.shape[0]
    V, fourH = embed_proj.shape
    L, B, H = h0_all.shape
    assert fourH == 4 * H
    T = TB // B
    O = w_l1.shape[0]

    def kernel(*refs):
        ids_ref, embp_ref, whh0_ref, b0_ref = refs[:4]
        pos = 4
        lrefs = []
        for _ in range(L - 1):
            lrefs.append(tuple(refs[pos:pos + 3]))
            pos += 3
        h0_ref, c0_ref, wl1_ref, bl1_ref, out_ref = refs[pos:pos + 5]

        # ---- Embedding gather + layer-0 input projection, fused & hoisted
        # off the serial chain: one-hot matmul against the pre-projected
        # (V, 4H) table, one MXU push for all T*B rows. ----
        ids = ids_ref[...]                                          # (T*B, 1)
        lanes = jax.lax.broadcasted_iota(jnp.int32, (TB, V), 1)
        onehot = (lanes == ids).astype(jnp.float32)                 # (T*B, V)
        x0 = jnp.dot(onehot, embp_ref[...],
                     preferred_element_type=jnp.float32) + b0_ref[...]  # (T*B, 4H)

        hs = [h0_ref[l] for l in range(L)]                          # each (B, H)
        cs = [c0_ref[l] for l in range(L)]

        def cell(gates, c_prev):
            # Whole-vreg nonlinearities: 2 EUP passes over (B, 4H) instead of 4
            # passes over 32-lane slices; then slice i, f, g, o.
            sig = jax.nn.sigmoid(gates)
            tnh = jnp.tanh(gates)
            i_g = sig[:, 0 * H:1 * H]
            f_g = sig[:, 1 * H:2 * H]
            o_g = sig[:, 3 * H:4 * H]
            g_g = tnh[:, 2 * H:3 * H]
            c_new = f_g * c_prev + i_g * g_g
            h_new = o_g * jnp.tanh(c_new)
            return h_new, c_new

        # Fully unrolled time recurrence (T small & static).
        for t in range(T):
            # Layer 0: only the recurrent matmul sits on the serial chain.
            g0 = x0[t * B:(t + 1) * B, :] + jnp.dot(
                hs[0], whh0_ref[...], preferred_element_type=jnp.float32)
            hs[0], cs[0] = cell(g0, cs[0])
            inp = hs[0]
            # Layers 1..L-1: two summed dots, no lane-axis concat.
            for li, (wih_ref, whh_ref, b_ref) in enumerate(lrefs, start=1):
                g = (jnp.dot(inp, wih_ref[...],
                             preferred_element_type=jnp.float32)
                     + jnp.dot(hs[li], whh_ref[...],
                               preferred_element_type=jnp.float32)
                     + b_ref[...])
                hs[li], cs[li] = cell(g, cs[li])
                inp = hs[li]

        last_h = hs[-1]                                             # (B, H)
        w1 = wl1_ref[...]                                           # (O, H)
        if O == 1:
            # O = 1: VPU multiply + lane reduce; skip the MXU entirely.
            z = jnp.sum(last_h * w1, axis=-1, keepdims=True)        # (B, 1)
        else:
            z = jnp.dot(last_h, w1.T, preferred_element_type=jnp.float32)
        out_ref[...] = jax.nn.sigmoid(z + bl1_ref[...])

    # All operands are tiny (< 100 KiB total) -> single full-array VMEM blocks.
    in_specs = [
        pl.BlockSpec((TB, 1), lambda i: (0, 0)),         # token ids
        pl.BlockSpec((V, 4 * H), lambda i: (0, 0)),      # pre-projected embedding
        pl.BlockSpec((H, 4 * H), lambda i: (0, 0)),      # W_hh0^T
        pl.BlockSpec((1, 4 * H), lambda i: (0, 0)),      # combined bias 0
    ]
    args = [ids_flat, embed_proj, w_hh0_t, b0]
    for (wih_t, whh_t, b) in layer_ws:
        in_specs += [pl.BlockSpec((H, 4 * H), lambda i: (0, 0)),
                     pl.BlockSpec((H, 4 * H), lambda i: (0, 0)),
                     pl.BlockSpec((1, 4 * H), lambda i: (0, 0))]
        args += [wih_t, whh_t, b]
    in_specs += [pl.BlockSpec((L, B, H), lambda i: (0, 0, 0)),
                 pl.BlockSpec((L, B, H), lambda i: (0, 0, 0)),
                 pl.BlockSpec((O, H), lambda i: (0, 0)),
                 pl.BlockSpec((1, O), lambda i: (0, 0))]
    args += [h0_all, c0_all, w_l1, b_l1]

    # TODO(synk): on v7x (2 TensorCores) a larger batch should be split across
    #   a leading "parallel" grid axis; at B=2 a single grid point is optimal.
    return pl.pallas_call(
        kernel,
        out_shape=jax.ShapeDtypeStruct((B, O), jnp.float32),
        grid_spec=pltpu.PrefetchScalarGridSpec(
            num_scalar_prefetch=0,
            grid=(1,),
            in_specs=in_specs,
            out_specs=pl.BlockSpec((B, O), lambda i: (0, 0))),
        compiler_params=pltpu.CompilerParams(
            dimension_semantics=("arbitrary",)),
    )(*args)


# ----------------------------------------------------------------------------
# Parameters (PyTorch-style) and one-time kernel-ready preprocessing.
# ----------------------------------------------------------------------------
def init_params(key, vocab_size, output_size, embedding_size, hidden_size, n_layers):
    params = {}
    k = 1.0 / jnp.sqrt(jnp.float32(hidden_size))
    keys = jax.random.split(key, 2 + 4 * n_layers + 2)
    ki = iter(keys)
    params["embed"] = jax.random.normal(next(ki), (vocab_size, embedding_size), jnp.float32)
    layers = []
    for layer in range(n_layers):
        in_sz = embedding_size if layer == 0 else hidden_size
        w_ih = jax.random.uniform(next(ki), (4 * hidden_size, in_sz), jnp.float32, -k, k)
        w_hh = jax.random.uniform(next(ki), (4 * hidden_size, hidden_size), jnp.float32, -k, k)
        b_ih = jax.random.uniform(next(ki), (4 * hidden_size,), jnp.float32, -k, k)
        b_hh = jax.random.uniform(next(ki), (4 * hidden_size,), jnp.float32, -k, k)
        layers.append({"w_ih": w_ih, "w_hh": w_hh, "b_ih": b_ih, "b_hh": b_hh})
    params["lstm"] = layers
    kl = 1.0 / jnp.sqrt(jnp.float32(hidden_size))
    params["l1_w"] = jax.random.uniform(next(ki), (output_size, hidden_size), jnp.float32, -kl, kl)
    params["l1_b"] = jax.random.uniform(next(ki), (output_size,), jnp.float32, -kl, kl)
    return params


def prepare_kernel_params(params):
    """One-time weight fusion / transposition (forward pass stays transpose-free).

    Layer-0's input weight is folded into the embedding table:
        embed_proj[v] = embed[v] @ W_ih0^T        (shape (V, 4H))
    so the per-step layer-0 input projection becomes a lookup that is hoisted
    entirely out of the recurrence inside the kernel.
    """
    lstm = params["lstm"]
    l0 = lstm[0]
    embed = jnp.asarray(params["embed"], jnp.float32)
    w_ih0_t = jnp.asarray(l0["w_ih"], jnp.float32).T                 # (E, 4H)
    prep = {
        "embed_proj": embed @ w_ih0_t,                               # (V, 4H)
        "w_hh0_t": jnp.asarray(l0["w_hh"], jnp.float32).T,           # (H, 4H)
        "b0": (l0["b_ih"] + l0["b_hh"]).astype(jnp.float32).reshape(1, -1),
    }
    layer_ws = []
    for lp in lstm[1:]:
        layer_ws.append((
            jnp.asarray(lp["w_ih"], jnp.float32).T,                  # (H, 4H)
            jnp.asarray(lp["w_hh"], jnp.float32).T,                  # (H, 4H)
            (lp["b_ih"] + lp["b_hh"]).astype(jnp.float32).reshape(1, -1),
        ))
    prep["layer_ws"] = layer_ws
    prep["l1_w"] = jnp.asarray(params["l1_w"], jnp.float32)          # (O, H)
    prep["l1_b"] = jnp.asarray(params["l1_b"], jnp.float32).reshape(1, -1)
    return prep


def init_hidden(n_layers, batch_size, hidden_size):
    h = jnp.zeros((n_layers, batch_size, hidden_size), jnp.float32)
    c = jnp.zeros((n_layers, batch_size, hidden_size), jnp.float32)
    return (h, c)


# ----------------------------------------------------------------------------
# Forward (mirrors LSTM_NN.forward in eval mode).
# ----------------------------------------------------------------------------
@jax.jit
def lstm_nn_forward(prep, x_tokens, hidden):
    h0_all, c0_all = hidden
    # (B, T) batch-first tokens -> (T*B, 1) time-major flat ids (row t*B + b).
    ids_flat = x_tokens.astype(jnp.int32).T.reshape(-1, 1)

    sig_out = fused_lstm_head(ids_flat, prep["embed_proj"], prep["w_hh0_t"],
                              prep["b0"], prep["layer_ws"], h0_all, c0_all,
                              prep["l1_w"], prep["l1_b"])

    # nn.Dropout / LSTM inter-layer dropout: identity in eval mode.
    # The PyTorch module returns the *input* hidden, not (h_n, c_n).
    return sig_out, hidden


# ----------------------------------------------------------------------------
# Pure-JAX reference (for correctness check).
# ----------------------------------------------------------------------------
def _reference_forward(params, x_tokens, hidden):
    h_all, c_all = hidden
    embeds = jnp.take(params["embed"], x_tokens.astype(jnp.int32), axis=0)  # (B,T,E)
    seq = jnp.transpose(embeds, (1, 0, 2))                                  # (T,B,E)
    T = seq.shape[0]
    H = h_all.shape[-1]
    inp_seq = seq
    for li, lp in enumerate(params["lstm"]):
        h, c = h_all[li], c_all[li]
        outs = []
        for t in range(T):
            g = (inp_seq[t] @ lp["w_ih"].T + h @ lp["w_hh"].T
                 + lp["b_ih"] + lp["b_hh"])
            i = jax.nn.sigmoid(g[:, 0 * H:1 * H])
            f = jax.nn.sigmoid(g[:, 1 * H:2 * H])
            gg = jnp.tanh(g[:, 2 * H:3 * H])
            o = jax.nn.sigmoid(g[:, 3 * H:4 * H])
            c = f * c + i * gg
            h = o * jnp.tanh(c)
            outs.append(h)
        inp_seq = jnp.stack(outs, axis=0)
    last = inp_seq[-1]
    return jax.nn.sigmoid(last @ params["l1_w"].T + params["l1_b"])


if __name__ == "__main__":
    vocab_size = 50
    output_size = 1
    embedding_size = 32
    hidden_size = 32
    n_layers = 2
    batch = 2
    seq_len = 8

    key = jax.random.PRNGKey(0)
    pkey, xkey = jax.random.split(key)
    params = init_params(pkey, vocab_size, output_size, embedding_size,
                         hidden_size, n_layers)
    prep = prepare_kernel_params(params)

    x = jax.random.randint(xkey, (batch, seq_len), 0, vocab_size, jnp.int32)
    hidden = init_hidden(n_layers, batch, hidden_size)

    sig_out, hidden_out = lstm_nn_forward(prep, x, hidden)
    jax.block_until_ready(sig_out)
    jax.block_until_ready(hidden_out)

    assert sig_out.shape == (batch, output_size)
    assert bool(jnp.all((sig_out >= 0.0) & (sig_out <= 1.0)))

    ref = _reference_forward(params, x, hidden)
    assert bool(jnp.allclose(sig_out, ref, atol=1e-3, rtol=1e-3)), (
        f"kernel/reference mismatch: {sig_out} vs {ref}")

    print("KERNEL_OK")
</pallas_src>

<mosaic_0001>
module attributes {stable_mosaic.version = 11 : i64} {
  func.func @kernel(%arg0: i32, %arg1: memref<16x1xi32, #tpu.memory_space<vmem>>, %arg2: memref<50x128xf32, #tpu.memory_space<vmem>>, %arg3: memref<32x128xf32, #tpu.memory_space<vmem>>, %arg4: memref<1x128xf32, #tpu.memory_space<vmem>>, %arg5: memref<32x128xf32, #tpu.memory_space<vmem>>, %arg6: memref<32x128xf32, #tpu.memory_space<vmem>>, %arg7: memref<1x128xf32, #tpu.memory_space<vmem>>, %arg8: memref<2x2x32xf32, #tpu.memory_space<vmem>>, %arg9: memref<2x2x32xf32, #tpu.memory_space<vmem>>, %arg10: memref<1x32xf32, #tpu.memory_space<vmem>>, %arg11: memref<1x1xf32, #tpu.memory_space<vmem>>, %arg12: memref<2x1xf32, #tpu.memory_space<vmem>>) attributes {dimension_semantics = [#tpu.dimension_semantics<arbitrary>], iteration_bounds = array<i64: 1>, scalar_prefetch = 0 : i64, scratch_operands = 0 : i64, tpu.core_type = #tpu.core_type<tc>, window_params = [{pipeline_mode = #tpu.pipeline_mode<synchronous>, transform_indices = @transform_0, window_bounds = array<i64: 16, 1>}, {pipeline_mode = #tpu.pipeline_mode<synchronous>, transform_indices = @transform_1, window_bounds = array<i64: 50, 128>}, {pipeline_mode = #tpu.pipeline_mode<synchronous>, transform_indices = @transform_2, window_bounds = array<i64: 32, 128>}, {pipeline_mode = #tpu.pipeline_mode<synchronous>, transform_indices = @transform_3, window_bounds = array<i64: 1, 128>}, {pipeline_mode = #tpu.pipeline_mode<synchronous>, transform_indices = @transform_4, window_bounds = array<i64: 32, 128>}, {pipeline_mode = #tpu.pipeline_mode<synchronous>, transform_indices = @transform_5, window_bounds = array<i64: 32, 128>}, {pipeline_mode = #tpu.pipeline_mode<synchronous>, transform_indices = @transform_6, window_bounds = array<i64: 1, 128>}, {pipeline_mode = #tpu.pipeline_mode<synchronous>, transform_indices = @transform_7, window_bounds = array<i64: 2, 2, 32>}, {pipeline_mode = #tpu.pipeline_mode<synchronous>, transform_indices = @transform_8, window_bounds = array<i64: 2, 2, 32>}, {pipeline_mode = #tpu.pipeline_mode<synchronous>, transform_indices = @transform_9, window_bounds = array<i64: 1, 32>}, {pipeline_mode = #tpu.pipeline_mode<synchronous>, transform_indices = @transform_10, window_bounds = array<i64: 1, 1>}, {pipeline_mode = #tpu.pipeline_mode<synchronous>, transform_indices = @transform_11, window_bounds = array<i64: 2, 1>}]} {
    %c0 = arith.constant 0 : index
    %c0_0 = arith.constant 0 : index
    %0 = vector.load %arg1[%c0, %c0_0] : memref<16x1xi32, #tpu.memory_space<vmem>>, vector<16x1xi32>
    %1 = tpu.iota {dimensions = array<i32: 1>} : vector<16x50xi32>
    %2 = vector.broadcast %0 : vector<16x1xi32> to vector<16x50xi32>
    %3 = arith.cmpi eq, %1, %2 : vector<16x50xi32>
    %4 = arith.extui %3 : vector<16x50xi1> to vector<16x50xi32>
    %5 = arith.sitofp %4 : vector<16x50xi32> to vector<16x50xf32>
    %c0_1 = arith.constant 0 : index
    %c0_2 = arith.constant 0 : index
    %6 = vector.load %arg2[%c0_1, %c0_2] : memref<50x128xf32, #tpu.memory_space<vmem>>, vector<50x128xf32>
    %cst = arith.constant dense<0.000000e+00> : vector<16x128xf32>
    %7 = tpu.matmul %5, %6, %cst {dimension_numbers = #tpu.dot_dimension_numbers<[1], [0], [0], [1], [0, 0, 1, 1], [], []>} : vector<16x50xf32>, vector<50x128xf32>, vector<16x128xf32> -> vector<16x128xf32>
    %c0_3 = arith.constant 0 : index
    %c0_4 = arith.constant 0 : index
    %8 = vector.load %arg4[%c0_3, %c0_4] : memref<1x128xf32, #tpu.memory_space<vmem>>, vector<1x128xf32>
    %9 = vector.broadcast %8 : vector<1x128xf32> to vector<16x128xf32>
    %10 = arith.addf %7, %9 : vector<16x128xf32>
    %c0_5 = arith.constant 0 : index
    %c0_6 = arith.constant 0 : index
    %c0_7 = arith.constant 0 : index
    %11 = vector.load %arg8[%c0_5, %c0_6, %c0_7] : memref<2x2x32xf32, #tpu.memory_space<vmem>>, vector<1x2x32xf32>
    %12 = vector.shape_cast %11 : vector<1x2x32xf32> to vector<2x32xf32>
    %c1 = arith.constant 1 : index
    %c0_8 = arith.constant 0 : index
    %c0_9 = arith.constant 0 : index
    %13 = vector.load %arg8[%c1, %c0_8, %c0_9] : memref<2x2x32xf32, #tpu.memory_space<vmem>>, vector<1x2x32xf32>
    %14 = vector.shape_cast %13 : vector<1x2x32xf32> to vector<2x32xf32>
    %c0_10 = arith.constant 0 : index
    %c0_11 = arith.constant 0 : index
    %c0_12 = arith.constant 0 : index
    %15 = vector.load %arg9[%c0_10, %c0_11, %c0_12] : memref<2x2x32xf32, #tpu.memory_space<vmem>>, vector<1x2x32xf32>
    %16 = vector.shape_cast %15 : vector<1x2x32xf32> to vector<2x32xf32>
    %c1_13 = arith.constant 1 : index
    %c0_14 = arith.constant 0 : index
    %c0_15 = arith.constant 0 : index
    %17 = vector.load %arg9[%c1_13, %c0_14, %c0_15] : memref<2x2x32xf32, #tpu.memory_space<vmem>>, vector<1x2x32xf32>
    %18 = vector.shape_cast %17 : vector<1x2x32xf32> to vector<2x32xf32>
    %19 = vector.extract_strided_slice %10 {offsets = [0, 0], sizes = [2, 128], strides = [1, 1]} : vector<16x128xf32> to vector<2x128xf32>
    %c0_16 = arith.constant 0 : index
    %c0_17 = arith.constant 0 : index
    %20 = vector.load %arg3[%c0_16, %c0_17] : memref<32x128xf32, #tpu.memory_space<vmem>>, vector<32x128xf32>
    %cst_18 = arith.constant dense<0.000000e+00> : vector<2x128xf32>
    %21 = tpu.matmul %12, %20, %cst_18 {dimension_numbers = #tpu.dot_dimension_numbers<[1], [0], [0], [1], [0, 0, 1, 1], [], []>} : vector<2x32xf32>, vector<32x128xf32>, vector<2x128xf32> -> vector<2x128xf32>
    %22 = arith.addf %19, %21 : vector<2x128xf32>
    %23 = arith.negf %22 : vector<2x128xf32>
    %24 = math.exp %23 : vector<2x128xf32>
    %cst_19 = arith.constant 1.000000e+00 : f32
    %25 = vector.broadcast %cst_19 : f32 to vector<2x128xf32>
    %26 = arith.addf %25, %24 : vector<2x128xf32>
    %27 = arith.divf %25, %26 : vector<2x128xf32>
    %28 = math.tanh %22 : vector<2x128xf32>
    %29 = vector.extract_strided_slice %27 {offsets = [0, 0], sizes = [2, 32], strides = [1, 1]} : vector<2x128xf32> to vector<2x32xf32>
    %30 = vector.extract_strided_slice %27 {offsets = [0, 32], sizes = [2, 32], strides = [1, 1]} : vector<2x128xf32> to vector<2x32xf32>
    %31 = vector.extract_strided_slice %27 {offsets = [0, 96], sizes = [2, 32], strides = [1, 1]} : vector<2x128xf32> to vector<2x32xf32>
    %32 = vector.extract_strided_slice %28 {offsets = [0, 64], sizes = [2, 32], strides = [1, 1]} : vector<2x128xf32> to vector<2x32xf32>
    %33 = arith.mulf %30, %16 : vector<2x32xf32>
    %34 = arith.mulf %29, %32 : vector<2x32xf32>
    %35 = arith.addf %33, %34 : vector<2x32xf32>
    %36 = math.tanh %35 : vector<2x32xf32>
    %37 = arith.mulf %31, %36 : vector<2x32xf32>
    %c0_20 = arith.constant 0 : index
    %c0_21 = arith.constant 0 : index
    %38 = vector.load %arg5[%c0_20, %c0_21] : memref<32x128xf32, #tpu.memory_space<vmem>>, vector<32x128xf32>
    %cst_22 = arith.constant dense<0.000000e+00> : vector<2x128xf32>
    %39 = tpu.matmul %37, %38, %cst_22 {dimension_numbers = #tpu.dot_dimension_numbers<[1], [0], [0], [1], [0, 0, 1, 1], [], []>} : vector<2x32xf32>, vector<32x128xf32>, vector<2x128xf32> -> vector<2x128xf32>
    %c0_23 = arith.constant 0 : index
    %c0_24 = arith.constant 0 : index
    %40 = vector.load %arg6[%c0_23, %c0_24] : memref<32x128xf32, #tpu.memory_space<vmem>>, vector<32x128xf32>
    %cst_25 = arith.constant dense<0.000000e+00> : vector<2x128xf32>
    %41 = tpu.matmul %14, %40, %cst_25 {dimension_numbers = #tpu.dot_dimension_numbers<[1], [0], [0], [1], [0, 0, 1, 1], [], []>} : vector<2x32xf32>, vector<32x128xf32>, vector<2x128xf32> -> vector<2x128xf32>
    %42 = arith.addf %39, %41 : vector<2x128xf32>
    %c0_26 = arith.constant 0 : index
    %c0_27 = arith.constant 0 : index
    %43 = vector.load %arg7[%c0_26, %c0_27] : memref<1x128xf32, #tpu.memory_space<vmem>>, vector<1x128xf32>
    %44 = vector.broadcast %43 : vector<1x128xf32> to vector<2x128xf32>
    %45 = arith.addf %42, %44 : vector<2x128xf32>
    %46 = arith.negf %45 : vector<2x128xf32>
    %47 = math.exp %46 : vector<2x128xf32>
    %cst_28 = arith.constant 1.000000e+00 : f32
    %48 = vector.broadcast %cst_28 : f32 to vector<2x128xf32>
    %49 = arith.addf %48, %47 : vector<2x128xf32>
    %50 = arith.divf %48, %49 : vector<2x128xf32>
    %51 = math.tanh %45 : vector<2x128xf32>
    %52 = vector.extract_strided_slice %50 {offsets = [0, 0], sizes = [2, 32], strides = [1, 1]} : vector<2x128xf32> to vector<2x32xf32>
    %53 = vector.extract_strided_slice %50 {offsets = [0, 32], sizes = [2, 32], strides = [1, 1]} : vector<2x128xf32> to vector<2x32xf32>
    %54 = vector.extract_strided_slice %50 {offsets = [0, 96], sizes = [2, 32], strides = [1, 1]} : vector<2x128xf32> to vector<2x32xf32>
    %55 = vector.extract_strided_slice %51 {offsets = [0, 64], sizes = [2, 32], strides = [1, 1]} : vector<2x128xf32> to vector<2x32xf32>
    %56 = arith.mulf %53, %18 : vector<2x32xf32>
    %57 = arith.mulf %52, %55 : vector<2x32xf32>
    %58 = arith.addf %56, %57 : vector<2x32xf32>
    %59 = math.tanh %58 : vector<2x32xf32>
    %60 = arith.mulf %54, %59 : vector<2x32xf32>
    %61 = vector.extract_strided_slice %10 {offsets = [2, 0], sizes = [2, 128], strides = [1, 1]} : vector<16x128xf32> to vector<2x128xf32>
    %c0_29 = arith.constant 0 : index
    %c0_30 = arith.constant 0 : index
    %62 = vector.load %arg3[%c0_29, %c0_30] : memref<32x128xf32, #tpu.memory_space<vmem>>, vector<32x128xf32>
    %cst_31 = arith.constant dense<0.000000e+00> : vector<2x128xf32>
    %63 = tpu.matmul %37, %62, %cst_31 {dimension_numbers = #tpu.dot_dimension_numbers<[1], [0], [0], [1], [0, 0, 1, 1], [], []>} : vector<2x32xf32>, vector<32x128xf32>, vector<2x128xf32> -> vector<2x128xf32>
    %64 = arith.addf %61, %63 : vector<2x128xf32>
    %65 = arith.negf %64 : vector<2x128xf32>
    %66 = math.exp %65 : vector<2x128xf32>
    %cst_32 = arith.constant 1.000000e+00 : f32
    %67 = vector.broadcast %cst_32 : f32 to vector<2x128xf32>
    %68 = arith.addf %67, %66 : vector<2x128xf32>
    %69 = arith.divf %67, %68 : vector<2x128xf32>
    %70 = math.tanh %64 : vector<2x128xf32>
    %71 = vector.extract_strided_slice %69 {offsets = [0, 0], sizes = [2, 32], strides = [1, 1]} : vector<2x128xf32> to vector<2x32xf32>
    %72 = vector.extract_strided_slice %69 {offsets = [0, 32], sizes = [2, 32], strides = [1, 1]} : vector<2x128xf32> to vector<2x32xf32>
    %73 = vector.extract_strided_slice %69 {offsets = [0, 96], sizes = [2, 32], strides = [1, 1]} : vector<2x128xf32> to vector<2x32xf32>
    %74 = vector.extract_strided_slice %70 {offsets = [0, 64], sizes = [2, 32], strides = [1, 1]} : vector<2x128xf32> to vector<2x32xf32>
    %75 = arith.mulf %72, %35 : vector<2x32xf32>
    %76 = arith.mulf %71, %74 : vector<2x32xf32>
    %77 = arith.addf %75, %76 : vector<2x32xf32>
    %78 = math.tanh %77 : vector<2x32xf32>
    %79 = arith.mulf %73, %78 : vector<2x32xf32>
    %c0_33 = arith.constant 0 : index
    %c0_34 = arith.constant 0 : index
    %80 = vector.load %arg5[%c0_33, %c0_34] : memref<32x128xf32, #tpu.memory_space<vmem>>, vector<32x128xf32>
    %cst_35 = arith.constant dense<0.000000e+00> : vector<2x128xf32>
    %81 = tpu.matmul %79, %80, %cst_35 {dimension_numbers = #tpu.dot_dimension_numbers<[1], [0], [0], [1], [0, 0, 1, 1], [], []>} : vector<2x32xf32>, vector<32x128xf32>, vector<2x128xf32> -> vector<2x128xf32>
    %c0_36 = arith.constant 0 : index
    %c0_37 = arith.constant 0 : index
    %82 = vector.load %arg6[%c0_36, %c0_37] : memref<32x128xf32, #tpu.memory_space<vmem>>, vector<32x128xf32>
    %cst_38 = arith.constant dense<0.000000e+00> : vector<2x128xf32>
    %83 = tpu.matmul %60, %82, %cst_38 {dimension_numbers = #tpu.dot_dimension_numbers<[1], [0], [0], [1], [0, 0, 1, 1], [], []>} : vector<2x32xf32>, vector<32x128xf32>, vector<2x128xf32> -> vector<2x128xf32>
    %84 = arith.addf %81, %83 : vector<2x128xf32>
    %c0_39 = arith.constant 0 : index
    %c0_40 = arith.constant 0 : index
    %85 = vector.load %arg7[%c0_39, %c0_40] : memref<1x128xf32, #tpu.memory_space<vmem>>, vector<1x128xf32>
    %86 = vector.broadcast %85 : vector<1x128xf32> to vector<2x128xf32>
    %87 = arith.addf %84, %86 : vector<2x128xf32>
    %88 = arith.negf %87 : vector<2x128xf32>
    %89 = math.exp %88 : vector<2x128xf32>
    %cst_41 = arith.constant 1.000000e+00 : f32
    %90 = vector.broadcast %cst_41 : f32 to vector<2x128xf32>
    %91 = arith.addf %90, %89 : vector<2x128xf32>
    %92 = arith.divf %90, %91 : vector<2x128xf32>
    %93 = math.tanh %87 : vector<2x128xf32>
    %94 = vector.extract_strided_slice %92 {offsets = [0, 0], sizes = [2, 32], strides = [1, 1]} : vector<2x128xf32> to vector<2x32xf32>
    %95 = vector.extract_strided_slice %92 {offsets = [0, 32], sizes = [2, 32], strides = [1, 1]} : vector<2x128xf32> to vector<2x32xf32>
    %96 = vector.extract_strided_slice %92 {offsets = [0, 96], sizes = [2, 32], strides = [1, 1]} : vector<2x128xf32> to vector<2x32xf32>
    %97 = vector.extract_strided_slice %93 {offsets = [0, 64], sizes = [2, 32], strides = [1, 1]} : vector<2x128xf32> to vector<2x32xf32>
    %98 = arith.mulf %95, %58 : vector<2x32xf32>
    %99 = arith.mulf %94, %97 : vector<2x32xf32>
    %100 = arith.addf %98, %99 : vector<2x32xf32>
    %101 = math.tanh %100 : vector<2x32xf32>
    %102 = arith.mulf %96, %101 : vector<2x32xf32>
    %103 = vector.extract_strided_slice %10 {offsets = [4, 0], sizes = [2, 128], strides = [1, 1]} : vector<16x128xf32> to vector<2x128xf32>
    %c0_42 = arith.constant 0 : index
    %c0_43 = arith.constant 0 : index
    %104 = vector.load %arg3[%c0_42, %c0_43] : memref<32x128xf32, #tpu.memory_space<vmem>>, vector<32x128xf32>
    %cst_44 = arith.constant dense<0.000000e+00> : vector<2x128xf32>
    %105 = tpu.matmul %79, %104, %cst_44 {dimension_numbers = #tpu.dot_dimension_numbers<[1], [0], [0], [1], [0, 0, 1, 1], [], []>} : vector<2x32xf32>, vector<32x128xf32>, vector<2x128xf32> -> vector<2x128xf32>
    %106 = arith.addf %103, %105 : vector<2x128xf32>
    %107 = arith.negf %106 : vector<2x128xf32>
    %108 = math.exp %107 : vector<2x128xf32>
    %cst_45 = arith.constant 1.000000e+00 : f32
    %109 = vector.broadcast %cst_45 : f32 to vector<2x128xf32>
    %110 = arith.addf %109, %108 : vector<2x128xf32>
    %111 = arith.divf %109, %110 : vector<2x128xf32>
    %112 = math.tanh %106 : vector<2x128xf32>
    %113 = vector.extract_strided_slice %111 {offsets = [0, 0], sizes = [2, 32], strides = [1, 1]} : vector<2x128xf32> to vector<2x32xf32>
    %114 = vector.extract_strided_slice %111 {offsets = [0, 32], sizes = [2, 32], strides = [1, 1]} : vector<2x128xf32> to vector<2x32xf32>
    %115 = vector.extract_strided_slice %111 {offsets = [0, 96], sizes = [2, 32], strides = [1, 1]} : vector<2x128xf32> to vector<2x32xf32>
    %116 = vector.extract_strided_slice %112 {offsets = [0, 64], sizes = [2, 32], strides = [1, 1]} : vector<2x128xf32> to vector<2x32xf32>
    %117 = arith.mulf %114, %77 : vector<2x32xf32>
    %118 = arith.mulf %113, %116 : vector<2x32xf32>
    %119 = arith.addf %117, %118 : vector<2x32xf32>
    %120 = math.tanh %119 : vector<2x32xf32>
    %121 = arith.mulf %115, %120 : vector<2x32xf32>
    %c0_46 = arith.constant 0 : index
    %c0_47 = arith.constant 0 : index
    %122 = vector.load %arg5[%c0_46, %c0_47] : memref<32x128xf32, #tpu.memory_space<vmem>>, vector<32x128xf32>
    %cst_48 = arith.constant dense<0.000000e+00> : vector<2x128xf32>
    %123 = tpu.matmul %121, %122, %cst_48 {dimension_numbers = #tpu.dot_dimension_numbers<[1], [0], [0], [1], [0, 0, 1, 1], [], []>} : vector<2x32xf32>, vector<32x128xf32>, vector<2x128xf32> -> vector<2x128xf32>
    %c0_49 = arith.constant 0 : index
    %c0_50 = arith.constant 0 : index
    %124 = vector.load %arg6[%c0_49, %c0_50] : memref<32x128xf32, #tpu.memory_space<vmem>>, vector<32x128xf32>
    %cst_51 = arith.constant dense<0.000000e+00> : vector<2x128xf32>
    %125 = tpu.matmul %102, %124, %cst_51 {dimension_numbers = #tpu.dot_dimension_numbers<[1], [0], [0], [1], [0, 0, 1, 1], [], []>} : vector<2x32xf32>, vector<32x128xf32>, vector<2x128xf32> -> vector<2x128xf32>
    %126 = arith.addf %123, %125 : vector<2x128xf32>
    %c0_52 = arith.constant 0 : index
    %c0_53 = arith.constant 0 : index
    %127 = vector.load %arg7[%c0_52, %c0_53] : memref<1x128xf32, #tpu.memory_space<vmem>>, vector<1x128xf32>
    %128 = vector.broadcast %127 : vector<1x128xf32> to vector<2x128xf32>
    %129 = arith.addf %126, %128 : vector<2x128xf32>
    %130 = arith.negf %129 : vector<2x128xf32>
    %131 = math.exp %130 : vector<2x128xf32>
    %cst_54 = arith.constant 1.000000e+00 : f32
    %132 = vector.broadcast %cst_54 : f32 to vector<2x128xf32>
    %133 = arith.addf %132, %131 : vector<2x128xf32>
    %134 = arith.divf %132, %133 : vector<2x128xf32>
    %135 = math.tanh %129 : vector<2x128xf32>
    %136 = vector.extract_strided_slice %134 {offsets = [0, 0], sizes = [2, 32], strides = [1, 1]} : vector<2x128xf32> to vector<2x32xf32>
    %137 = vector.extract_strided_slice %134 {offsets = [0, 32], sizes = [2, 32], strides = [1, 1]} : vector<2x128xf32> to vector<2x32xf32>
    %138 = vector.extract_strided_slice %134 {offsets = [0, 96], sizes = [2, 32], strides = [1, 1]} : vector<2x128xf32> to vector<2x32xf32>
    %139 = vector.extract_strided_slice %135 {offsets = [0, 64], sizes = [2, 32], strides = [1, 1]} : vector<2x128xf32> to vector<2x32xf32>
    %140 = arith.mulf %137, %100 : vector<2x32xf32>
    %141 = arith.mulf %136, %139 : vector<2x32xf32>
    %142 = arith.addf %140, %141 : vector<2x32xf32>
    %143 = math.tanh %142 : vector<2x32xf32>
    %144 = arith.mulf %138, %143 : vector<2x32xf32>
    %145 = vector.extract_strided_slice %10 {offsets = [6, 0], sizes = [2, 128], strides = [1, 1]} : vector<16x128xf32> to vector<2x128xf32>
    %c0_55 = arith.constant 0 : index
    %c0_56 = arith.constant 0 : index
    %146 = vector.load %arg3[%c0_55, %c0_56] : memref<32x128xf32, #tpu.memory_space<vmem>>, vector<32x128xf32>
    %cst_57 = arith.constant dense<0.000000e+00> : vector<2x128xf32>
    %147 = tpu.matmul %121, %146, %cst_57 {dimension_numbers = #tpu.dot_dimension_numbers<[1], [0], [0], [1], [0, 0, 1, 1], [], []>} : vector<2x32xf32>, vector<32x128xf32>, vector<2x128xf32> -> vector<2x128xf32>
    %148 = arith.addf %145, %147 : vector<2x128xf32>
    %149 = arith.negf %148 : vector<2x128xf32>
    %150 = math.exp %149 : vector<2x128xf32>
    %cst_58 = arith.constant 1.000000e+00 : f32
    %151 = vector.broadcast %cst_58 : f32 to vector<2x128xf32>
    %152 = arith.addf %151, %150 : vector<2x128xf32>
    %153 = arith.divf %151, %152 : vector<2x128xf32>
    %154 = math.tanh %148 : vector<2x128xf32>
    %155 = vector.extract_strided_slice %153 {offsets = [0, 0], sizes = [2, 32], strides = [1, 1]} : vector<2x128xf32> to vector<2x32xf32>
    %156 = vector.extract_strided_slice %153 {offsets = [0, 32], sizes = [2, 32], strides = [1, 1]} : vector<2x128xf32> to vector<2x32xf32>
    %157 = vector.extract_strided_slice %153 {offsets = [0, 96], sizes = [2, 32], strides = [1, 1]} : vector<2x128xf32> to vector<2x32xf32>
    %158 = vector.extract_strided_slice %154 {offsets = [0, 64], sizes = [2, 32], strides = [1, 1]} : vector<2x128xf32> to vector<2x32xf32>
    %159 = arith.mulf %156, %119 : vector<2x32xf32>
    %160 = arith.mulf %155, %158 : vector<2x32xf32>
    %161 = arith.addf %159, %160 : vector<2x32xf32>
    %162 = math.tanh %161 : vector<2x32xf32>
    %163 = arith.mulf %157, %162 : vector<2x32xf32>
    %c0_59 = arith.constant 0 : index
    %c0_60 = arith.constant 0 : index
    %164 = vector.load %arg5[%c0_59, %c0_60] : memref<32x128xf32, #tpu.memory_space<vmem>>, vector<32x128xf32>
    %cst_61 = arith.constant dense<0.000000e+00> : vector<2x128xf32>
    %165 = tpu.matmul %163, %164, %cst_61 {dimension_numbers = #tpu.dot_dimension_numbers<[1], [0], [0], [1], [0, 0, 1, 1], [], []>} : vector<2x32xf32>, vector<32x128xf32>, vector<2x128xf32> -> vector<2x128xf32>
    %c0_62 = arith.constant 0 : index
    %c0_63 = arith.constant 0 : index
    %166 = vector.load %arg6[%c0_62, %c0_63] : memref<32x128xf32, #tpu.memory_space<vmem>>, vector<32x128xf32>
    %cst_64 = arith.constant dense<0.000000e+00> : vector<2x128xf32>
    %167 = tpu.matmul %144, %166, %cst_64 {dimension_numbers = #tpu.dot_dimension_numbers<[1], [0], [0], [1], [0, 0, 1, 1], [], []>} : vector<2x32xf32>, vector<32x128xf32>, vector<2x128xf32> -> vector<2x128xf32>
    %168 = arith.addf %165, %167 : vector<2x128xf32>
    %c0_65 = arith.constant 0 : index
    %c0_66 = arith.constant 0 : index
    %169 = vector.load %arg7[%c0_65, %c0_66] : memref<1x128xf32, #tpu.memory_space<vmem>>, vector<1x128xf32>
    %170 = vector.broadcast %169 : vector<1x128xf32> to vector<2x128xf32>
    %171 = arith.addf %168, %170 : vector<2x128xf32>
    %172 = arith.negf %171 : vector<2x128xf32>
    %173 = math.exp %172 : vector<2x128xf32>
    %cst_67 = arith.constant 1.000000e+00 : f32
    %174 = vector.broadcast %cst_67 : f32 to vector<2x128xf32>
    %175 = arith.addf %174, %173 : vector<2x128xf32>
    %176 = arith.divf %174, %175 : vector<2x128xf32>
    %177 = math.tanh %171 : vector<2x128xf32>
    %178 = vector.extract_strided_slice %176 {offsets = [0, 0], sizes = [2, 32], strides = [1, 1]} : vector<2x128xf32> to vector<2x32xf32>
    %179 = vector.extract_strided_slice %176 {offsets = [0, 32], sizes = [2, 32], strides = [1, 1]} : vector<2x128xf32> to vector<2x32xf32>
    %180 = vector.extract_strided_slice %176 {offsets = [0, 96], sizes = [2, 32], strides = [1, 1]} : vector<2x128xf32> to vector<2x32xf32>
    %181 = vector.extract_strided_slice %177 {offsets = [0, 64], sizes = [2, 32], strides = [1, 1]} : vector<2x128xf32> to vector<2x32xf32>
    %182 = arith.mulf %179, %142 : vector<2x32xf32>
    %183 = arith.mulf %178, %181 : vector<2x32xf32>
    %184 = arith.addf %182, %183 : vector<2x32xf32>
    %185 = math.tanh %184 : vector<2x32xf32>
    %186 = arith.mulf %180, %185 : vector<2x32xf32>
    %187 = vector.extract_strided_slice %10 {offsets = [8, 0], sizes = [2, 128], strides = [1, 1]} : vector<16x128xf32> to vector<2x128xf32>
    %c0_68 = arith.constant 0 : index
    %c0_69 = arith.constant 0 : index
    %188 = vector.load %arg3[%c0_68, %c0_69] : memref<32x128xf32, #tpu.memory_space<vmem>>, vector<32x128xf32>
    %cst_70 = arith.constant dense<0.000000e+00> : vector<2x128xf32>
    %189 = tpu.matmul %163, %188, %cst_70 {dimension_numbers = #tpu.dot_dimension_numbers<[1], [0], [0], [1], [0, 0, 1, 1], [], []>} : vector<2x32xf32>, vector<32x128xf32>, vector<2x128xf32> -> vector<2x128xf32>
    %190 = arith.addf %187, %189 : vector<2x128xf32>
    %191 = arith.negf %190 : vector<2x128xf32>
    %192 = math.exp %191 : vector<2x128xf32>
    %cst_71 = arith.constant 1.000000e+00 : f32
    %193 = vector.broadcast %cst_71 : f32 to vector<2x128xf32>
    %194 = arith.addf %193, %192 : vector<2x128xf32>
    %195 = arith.divf %193, %194 : vector<2x128xf32>
    %196 = math.tanh %190 : vector<2x128xf32>
    %197 = vector.extract_strided_slice %195 {offsets = [0, 0], sizes = [2, 32], strides = [1, 1]} : vector<2x128xf32> to vector<2x32xf32>
    %198 = vector.extract_strided_slice %195 {offsets = [0, 32], sizes = [2, 32], strides = [1, 1]} : vector<2x128xf32> to vector<2x32xf32>
    %199 = vector.extract_strided_slice %195 {offsets = [0, 96], sizes = [2, 32], strides = [1, 1]} : vector<2x128xf32> to vector<2x32xf32>
    %200 = vector.extract_strided_slice %196 {offsets = [0, 64], sizes = [2, 32], strides = [1, 1]} : vector<2x128xf32> to vector<2x32xf32>
    %201 = arith.mulf %198, %161 : vector<2x32xf32>
    %202 = arith.mulf %197, %200 : vector<2x32xf32>
    %203 = arith.addf %201, %202 : vector<2x32xf32>
    %204 = math.tanh %203 : vector<2x32xf32>
    %205 = arith.mulf %199, %204 : vector<2x32xf32>
    %c0_72 = arith.constant 0 : index
    %c0_73 = arith.constant 0 : index
    %206 = vector.load %arg5[%c0_72, %c0_73] : memref<32x128xf32, #tpu.memory_space<vmem>>, vector<32x128xf32>
    %cst_74 = arith.constant dense<0.000000e+00> : vector<2x128xf32>
    %207 = tpu.matmul %205, %206, %cst_74 {dimension_numbers = #tpu.dot_dimension_numbers<[1], [0], [0], [1], [0, 0, 1, 1], [], []>} : vector<2x32xf32>, vector<32x128xf32>, vector<2x128xf32> -> vector<2x128xf32>
    %c0_75 = arith.constant 0 : index
    %c0_76 = arith.constant 0 : index
    %208 = vector.load %arg6[%c0_75, %c0_76] : memref<32x128xf32, #tpu.memory_space<vmem>>, vector<32x128xf32>
    %cst_77 = arith.constant dense<0.000000e+00> : vector<2x128xf32>
    %209 = tpu.matmul %186, %208, %cst_77 {dimension_numbers = #tpu.dot_dimension_numbers<[1], [0], [0], [1], [0, 0, 1, 1], [], []>} : vector<2x32xf32>, vector<32x128xf32>, vector<2x128xf32> -> vector<2x128xf32>
    %210 = arith.addf %207, %209 : vector<2x128xf32>
    %c0_78 = arith.constant 0 : index
    %c0_79 = arith.constant 0 : index
    %211 = vector.load %arg7[%c0_78, %c0_79] : memref<1x128xf32, #tpu.memory_space<vmem>>, vector<1x128xf32>
    %212 = vector.broadcast %211 : vector<1x128xf32> to vector<2x128xf32>
    %213 = arith.addf %210, %212 : vector<2x128xf32>
    %214 = arith.negf %213 : vector<2x128xf32>
    %215 = math.exp %214 : vector<2x128xf32>
    %cst_80 = arith.constant 1.000000e+00 : f32
    %216 = vector.broadcast %cst_80 : f32 to vector<2x128xf32>
    %217 = arith.addf %216, %215 : vector<2x128xf32>
    %218 = arith.divf %216, %217 : vector<2x128xf32>
    %219 = math.tanh %213 : vector<2x128xf32>
    %220 = vector.extract_strided_slice %218 {offsets = [0, 0], sizes = [2, 32], strides = [1, 1]} : vector<2x128xf32> to vector<2x32xf32>
    %221 = vector.extract_strided_slice %218 {offsets = [0, 32], sizes = [2, 32], strides = [1, 1]} : vector<2x128xf32> to vector<2x32xf32>
    %222 = vector.extract_strided_slice %218 {offsets = [0, 96], sizes = [2, 32], strides = [1, 1]} : vector<2x128xf32> to vector<2x32xf32>
    %223 = vector.extract_strided_slice %219 {offsets = [0, 64], sizes = [2, 32], strides = [1, 1]} : vector<2x128xf32> to vector<2x32xf32>
    %224 = arith.mulf %221, %184 : vector<2x32xf32>
    %225 = arith.mulf %220, %223 : vector<2x32xf32>
    %226 = arith.addf %224, %225 : vector<2x32xf32>
    %227 = math.tanh %226 : vector<2x32xf32>
    %228 = arith.mulf %222, %227 : vector<2x32xf32>
    %229 = vector.extract_strided_slice %10 {offsets = [10, 0], sizes = [2, 128], strides = [1, 1]} : vector<16x128xf32> to vector<2x128xf32>
    %c0_81 = arith.constant 0 : index
    %c0_82 = arith.constant 0 : index
    %230 = vector.load %arg3[%c0_81, %c0_82] : memref<32x128xf32, #tpu.memory_space<vmem>>, vector<32x128xf32>
    %cst_83 = arith.constant dense<0.000000e+00> : vector<2x128xf32>
    %231 = tpu.matmul %205, %230, %cst_83 {dimension_numbers = #tpu.dot_dimension_numbers<[1], [0], [0], [1], [0, 0, 1, 1], [], []>} : vector<2x32xf32>, vector<32x128xf32>, vector<2x128xf32> -> vector<2x128xf32>
    %232 = arith.addf %229, %231 : vector<2x128xf32>
    %233 = arith.negf %232 : vector<2x128xf32>
    %234 = math.exp %233 : vector<2x128xf32>
    %cst_84 = arith.constant 1.000000e+00 : f32
    %235 = vector.broadcast %cst_84 : f32 to vector<2x128xf32>
    %236 = arith.addf %235, %234 : vector<2x128xf32>
    %237 = arith.divf %235, %236 : vector<2x128xf32>
    %238 = math.tanh %232 : vector<2x128xf32>
    %239 = vector.extract_strided_slice %237 {offsets = [0, 0], sizes = [2, 32], strides = [1, 1]} : vector<2x128xf32> to vector<2x32xf32>
    %240 = vector.extract_strided_slice %237 {offsets = [0, 32], sizes = [2, 32], strides = [1, 1]} : vector<2x128xf32> to vector<2x32xf32>
    %241 = vector.extract_strided_slice %237 {offsets = [0, 96], sizes = [2, 32], strides = [1, 1]} : vector<2x128xf32> to vector<2x32xf32>
    %242 = vector.extract_strided_slice %238 {offsets = [0, 64], sizes = [2, 32], strides = [1, 1]} : vector<2x128xf32> to vector<2x32xf32>
    %243 = arith.mulf %240, %203 : vector<2x32xf32>
    %244 = arith.mulf %239, %242 : vector<2x32xf32>
    %245 = arith.addf %243, %244 : vector<2x32xf32>
    %246 = math.tanh %245 : vector<2x32xf32>
    %247 = arith.mulf %241, %246 : vector<2x32xf32>
    %c0_85 = arith.constant 0 : index
    %c0_86 = arith.constant 0 : index
    %248 = vector.load %arg5[%c0_85, %c0_86] : memref<32x128xf32, #tpu.memory_space<vmem>>, vector<32x128xf32>
    %cst_87 = arith.constant dense<0.000000e+00> : vector<2x128xf32>
    %249 = tpu.matmul %247, %248, %cst_87 {dimension_numbers = #tpu.dot_dimension_numbers<[1], [0], [0], [1], [0, 0, 1, 1], [], []>} : vector<2x32xf32>, vector<32x128xf32>, vector<2x128xf32> -> vector<2x128xf32>
    %c0_88 = arith.constant 0 : index
    %c0_89 = arith.constant 0 : index
    %250 = vector.load %arg6[%c0_88, %c0_89] : memref<32x128xf32, #tpu.memory_space<vmem>>, vector<32x128xf32>
    %cst_90 = arith.constant dense<0.000000e+00> : vector<2x128xf32>
    %251 = tpu.matmul %228, %250, %cst_90 {dimension_numbers = #tpu.dot_dimension_numbers<[1], [0], [0], [1], [0, 0, 1, 1], [], []>} : vector<2x32xf32>, vector<32x128xf32>, vector<2x128xf32> -> vector<2x128xf32>
    %252 = arith.addf %249, %251 : vector<2x128xf32>
    %c0_91 = arith.constant 0 : index
    %c0_92 = arith.constant 0 : index
    %253 = vector.load %arg7[%c0_91, %c0_92] : memref<1x128xf32, #tpu.memory_space<vmem>>, vector<1x128xf32>
    %254 = vector.broadcast %253 : vector<1x128xf32> to vector<2x128xf32>
    %255 = arith.addf %252, %254 : vector<2x128xf32>
    %256 = arith.negf %255 : vector<2x128xf32>
    %257 = math.exp %256 : vector<2x128xf32>
    %cst_93 = arith.constant 1.000000e+00 : f32
    %258 = vector.broadcast %cst_93 : f32 to vector<2x128xf32>
    %259 = arith.addf %258, %257 : vector<2x128xf32>
    %260 = arith.divf %258, %259 : vector<2x128xf32>
    %261 = math.tanh %255 : vector<2x128xf32>
    %262 = vector.extract_strided_slice %260 {offsets = [0, 0], sizes = [2, 32], strides = [1, 1]} : vector<2x128xf32> to vector<2x32xf32>
    %263 = vector.extract_strided_slice %260 {offsets = [0, 32], sizes = [2, 32], strides = [1, 1]} : vector<2x128xf32> to vector<2x32xf32>
    %264 = vector.extract_strided_slice %260 {offsets = [0, 96], sizes = [2, 32], strides = [1, 1]} : vector<2x128xf32> to vector<2x32xf32>
    %265 = vector.extract_strided_slice %261 {offsets = [0, 64], sizes = [2, 32], strides = [1, 1]} : vector<2x128xf32> to vector<2x32xf32>
    %266 = arith.mulf %263, %226 : vector<2x32xf32>
    %267 = arith.mulf %262, %265 : vector<2x32xf32>
    %268 = arith.addf %266, %267 : vector<2x32xf32>
    %269 = math.tanh %268 : vector<2x32xf32>
    %270 = arith.mulf %264, %269 : vector<2x32xf32>
    %271 = vector.extract_strided_slice %10 {offsets = [12, 0], sizes = [2, 128], strides = [1, 1]} : vector<16x128xf32> to vector<2x128xf32>
    %c0_94 = arith.constant 0 : index
    %c0_95 = arith.constant 0 : index
    %272 = vector.load %arg3[%c0_94, %c0_95] : memref<32x128xf32, #tpu.memory_space<vmem>>, vector<32x128xf32>
    %cst_96 = arith.constant dense<0.000000e+00> : vector<2x128xf32>
    %273 = tpu.matmul %247, %272, %cst_96 {dimension_numbers = #tpu.dot_dimension_numbers<[1], [0], [0], [1], [0, 0, 1, 1], [], []>} : vector<2x32xf32>, vector<32x128xf32>, vector<2x128xf32> -> vector<2x128xf32>
    %274 = arith.addf %271, %273 : vector<2x128xf32>
    %275 = arith.negf %274 : vector<2x128xf32>
    %276 = math.exp %275 : vector<2x128xf32>
    %cst_97 = arith.constant 1.000000e+00 : f32
    %277 = vector.broadcast %cst_97 : f32 to vector<2x128xf32>
    %278 = arith.addf %277, %276 : vector<2x128xf32>
    %279 = arith.divf %277, %278 : vector<2x128xf32>
    %280 = math.tanh %274 : vector<2x128xf32>
    %281 = vector.extract_strided_slice %279 {offsets = [0, 0], sizes = [2, 32], strides = [1, 1]} : vector<2x128xf32> to vector<2x32xf32>
    %282 = vector.extract_strided_slice %279 {offsets = [0, 32], sizes = [2, 32], strides = [1, 1]} : vector<2x128xf32> to vector<2x32xf32>
    %283 = vector.extract_strided_slice %279 {offsets = [0, 96], sizes = [2, 32], strides = [1, 1]} : vector<2x128xf32> to vector<2x32xf32>
    %284 = vector.extract_strided_slice %280 {offsets = [0, 64], sizes = [2, 32], strides = [1, 1]} : vector<2x128xf32> to vector<2x32xf32>
    %285 = arith.mulf %282, %245 : vector<2x32xf32>
    %286 = arith.mulf %281, %284 : vector<2x32xf32>
    %287 = arith.addf %285, %286 : vector<2x32xf32>
    %288 = math.tanh %287 : vector<2x32xf32>
    %289 = arith.mulf %283, %288 : vector<2x32xf32>
    %c0_98 = arith.constant 0 : index
    %c0_99 = arith.constant 0 : index
    %290 = vector.load %arg5[%c0_98, %c0_99] : memref<32x128xf32, #tpu.memory_space<vmem>>, vector<32x128xf32>
    %cst_100 = arith.constant dense<0.000000e+00> : vector<2x128xf32>
    %291 = tpu.matmul %289, %290, %cst_100 {dimension_numbers = #tpu.dot_dimension_numbers<[1], [0], [0], [1], [0, 0, 1, 1], [], []>} : vector<2x32xf32>, vector<32x128xf32>, vector<2x128xf32> -> vector<2x128xf32>
    %c0_101 = arith.constant 0 : index
    %c0_102 = arith.constant 0 : index
    %292 = vector.load %arg6[%c0_101, %c0_102] : memref<32x128xf32, #tpu.memory_space<vmem>>, vector<32x128xf32>
    %cst_103 = arith.constant dense<0.000000e+00> : vector<2x128xf32>
    %293 = tpu.matmul %270, %292, %cst_103 {dimension_numbers = #tpu.dot_dimension_numbers<[1], [0], [0], [1], [0, 0, 1, 1], [], []>} : vector<2x32xf32>, vector<32x128xf32>, vector<2x128xf32> -> vector<2x128xf32>
    %294 = arith.addf %291, %293 : vector<2x128xf32>
    %c0_104 = arith.constant 0 : index
    %c0_105 = arith.constant 0 : index
    %295 = vector.load %arg7[%c0_104, %c0_105] : memref<1x128xf32, #tpu.memory_space<vmem>>, vector<1x128xf32>
    %296 = vector.broadcast %295 : vector<1x128xf32> to vector<2x128xf32>
    %297 = arith.addf %294, %296 : vector<2x128xf32>
    %298 = arith.negf %297 : vector<2x128xf32>
    %299 = math.exp %298 : vector<2x128xf32>
    %cst_106 = arith.constant 1.000000e+00 : f32
    %300 = vector.broadcast %cst_106 : f32 to vector<2x128xf32>
    %301 = arith.addf %300, %299 : vector<2x128xf32>
    %302 = arith.divf %300, %301 : vector<2x128xf32>
    %303 = math.tanh %297 : vector<2x128xf32>
    %304 = vector.extract_strided_slice %302 {offsets = [0, 0], sizes = [2, 32], strides = [1, 1]} : vector<2x128xf32> to vector<2x32xf32>
    %305 = vector.extract_strided_slice %302 {offsets = [0, 32], sizes = [2, 32], strides = [1, 1]} : vector<2x128xf32> to vector<2x32xf32>
    %306 = vector.extract_strided_slice %302 {offsets = [0, 96], sizes = [2, 32], strides = [1, 1]} : vector<2x128xf32> to vector<2x32xf32>
    %307 = vector.extract_strided_slice %303 {offsets = [0, 64], sizes = [2, 32], strides = [1, 1]} : vector<2x128xf32> to vector<2x32xf32>
    %308 = arith.mulf %305, %268 : vector<2x32xf32>
    %309 = arith.mulf %304, %307 : vector<2x32xf32>
    %310 = arith.addf %308, %309 : vector<2x32xf32>
    %311 = math.tanh %310 : vector<2x32xf32>
    %312 = arith.mulf %306, %311 : vector<2x32xf32>
    %313 = vector.extract_strided_slice %10 {offsets = [14, 0], sizes = [2, 128], strides = [1, 1]} : vector<16x128xf32> to vector<2x128xf32>
    %c0_107 = arith.constant 0 : index
    %c0_108 = arith.constant 0 : index
    %314 = vector.load %arg3[%c0_107, %c0_108] : memref<32x128xf32, #tpu.memory_space<vmem>>, vector<32x128xf32>
    %cst_109 = arith.constant dense<0.000000e+00> : vector<2x128xf32>
    %315 = tpu.matmul %289, %314, %cst_109 {dimension_numbers = #tpu.dot_dimension_numbers<[1], [0], [0], [1], [0, 0, 1, 1], [], []>} : vector<2x32xf32>, vector<32x128xf32>, vector<2x128xf32> -> vector<2x128xf32>
    %316 = arith.addf %313, %315 : vector<2x128xf32>
    %317 = arith.negf %316 : vector<2x128xf32>
    %318 = math.exp %317 : vector<2x128xf32>
    %cst_110 = arith.constant 1.000000e+00 : f32
    %319 = vector.broadcast %cst_110 : f32 to vector<2x128xf32>
    %320 = arith.addf %319, %318 : vector<2x128xf32>
    %321 = arith.divf %319, %320 : vector<2x128xf32>
    %322 = math.tanh %316 : vector<2x128xf32>
    %323 = vector.extract_strided_slice %321 {offsets = [0, 0], sizes = [2, 32], strides = [1, 1]} : vector<2x128xf32> to vector<2x32xf32>
    %324 = vector.extract_strided_slice %321 {offsets = [0, 32], sizes = [2, 32], strides = [1, 1]} : vector<2x128xf32> to vector<2x32xf32>
    %325 = vector.extract_strided_slice %321 {offsets = [0, 96], sizes = [2, 32], strides = [1, 1]} : vector<2x128xf32> to vector<2x32xf32>
    %326 = vector.extract_strided_slice %322 {offsets = [0, 64], sizes = [2, 32], strides = [1, 1]} : vector<2x128xf32> to vector<2x32xf32>
    %327 = arith.mulf %324, %287 : vector<2x32xf32>
    %328 = arith.mulf %323, %326 : vector<2x32xf32>
    %329 = arith.addf %327, %328 : vector<2x32xf32>
    %330 = math.tanh %329 : vector<2x32xf32>
    %331 = arith.mulf %325, %330 : vector<2x32xf32>
    %c0_111 = arith.constant 0 : index
    %c0_112 = arith.constant 0 : index
    %332 = vector.load %arg5[%c0_111, %c0_112] : memref<32x128xf32, #tpu.memory_space<vmem>>, vector<32x128xf32>
    %cst_113 = arith.constant dense<0.000000e+00> : vector<2x128xf32>
    %333 = tpu.matmul %331, %332, %cst_113 {dimension_numbers = #tpu.dot_dimension_numbers<[1], [0], [0], [1], [0, 0, 1, 1], [], []>} : vector<2x32xf32>, vector<32x128xf32>, vector<2x128xf32> -> vector<2x128xf32>
    %c0_114 = arith.constant 0 : index
    %c0_115 = arith.constant 0 : index
    %334 = vector.load %arg6[%c0_114, %c0_115] : memref<32x128xf32, #tpu.memory_space<vmem>>, vector<32x128xf32>
    %cst_116 = arith.constant dense<0.000000e+00> : vector<2x128xf32>
    %335 = tpu.matmul %312, %334, %cst_116 {dimension_numbers = #tpu.dot_dimension_numbers<[1], [0], [0], [1], [0, 0, 1, 1], [], []>} : vector<2x32xf32>, vector<32x128xf32>, vector<2x128xf32> -> vector<2x128xf32>
    %336 = arith.addf %333, %335 : vector<2x128xf32>
    %c0_117 = arith.constant 0 : index
    %c0_118 = arith.constant 0 : index
    %337 = vector.load %arg7[%c0_117, %c0_118] : memref<1x128xf32, #tpu.memory_space<vmem>>, vector<1x128xf32>
    %338 = vector.broadcast %337 : vector<1x128xf32> to vector<2x128xf32>
    %339 = arith.addf %336, %338 : vector<2x128xf32>
    %340 = arith.negf %339 : vector<2x128xf32>
    %341 = math.exp %340 : vector<2x128xf32>
    %cst_119 = arith.constant 1.000000e+00 : f32
    %342 = vector.broadcast %cst_119 : f32 to vector<2x128xf32>
    %343 = arith.addf %342, %341 : vector<2x128xf32>
    %344 = arith.divf %342, %343 : vector<2x128xf32>
    %345 = math.tanh %339 : vector<2x128xf32>
    %346 = vector.extract_strided_slice %344 {offsets = [0, 0], sizes = [2, 32], strides = [1, 1]} : vector<2x128xf32> to vector<2x32xf32>
    %347 = vector.extract_strided_slice %344 {offsets = [0, 32], sizes = [2, 32], strides = [1, 1]} : vector<2x128xf32> to vector<2x32xf32>
    %348 = vector.extract_strided_slice %344 {offsets = [0, 96], sizes = [2, 32], strides = [1, 1]} : vector<2x128xf32> to vector<2x32xf32>
    %349 = vector.extract_strided_slice %345 {offsets = [0, 64], sizes = [2, 32], strides = [1, 1]} : vector<2x128xf32> to vector<2x32xf32>
    %350 = arith.mulf %347, %310 : vector<2x32xf32>
    %351 = arith.mulf %346, %349 : vector<2x32xf32>
    %352 = arith.addf %350, %351 : vector<2x32xf32>
    %353 = math.tanh %352 : vector<2x32xf32>
    %354 = arith.mulf %348, %353 : vector<2x32xf32>
    %c0_120 = arith.constant 0 : index
    %c0_121 = arith.constant 0 : index
    %355 = vector.load %arg10[%c0_120, %c0_121] : memref<1x32xf32, #tpu.memory_space<vmem>>, vector<1x32xf32>
    %356 = vector.broadcast %355 : vector<1x32xf32> to vector<2x32xf32>
    %357 = arith.mulf %354, %356 : vector<2x32xf32>
    %cst_122 = arith.constant dense<0.000000e+00> : vector<2xf32>
    %358 = vector.multi_reduction <add>, %357, %cst_122 [1] : vector<2x32xf32> to vector<2xf32>
    %359 = vector.shape_cast %358 : vector<2xf32> to vector<2x1xf32>
    %c0_123 = arith.constant 0 : index
    %c0_124 = arith.constant 0 : index
    %360 = vector.load %arg11[%c0_123, %c0_124] : memref<1x1xf32, #tpu.memory_space<vmem>>, vector<1x1xf32>
    %361 = vector.broadcast %360 : vector<1x1xf32> to vector<2x1xf32>
    %362 = arith.addf %359, %361 : vector<2x1xf32>
    %363 = arith.negf %362 : vector<2x1xf32>
    %364 = math.exp %363 : vector<2x1xf32>
    %cst_125 = arith.constant 1.000000e+00 : f32
    %365 = vector.broadcast %cst_125 : f32 to vector<2x1xf32>
    %366 = arith.addf %365, %364 : vector<2x1xf32>
    %367 = arith.divf %365, %366 : vector<2x1xf32>
    %c0_126 = arith.constant 0 : index
    %c0_127 = arith.constant 0 : index
    %368 = vector.load %arg12[%c0_126, %c0_127] : memref<2x1xf32, #tpu.memory_space<vmem>>, vector<2x1xf32>
    tpu.vector_store %arg12[%c0_126, %c0_127], %367 {strides = array<i32>} : memref<2x1xf32, #tpu.memory_space<vmem>>, vector<2x1xf32>,
    return
  }
  func.func @transform_0(%arg0: i32) -> (i32, i32) {
    %c0_i32 = arith.constant 0 : i32
    %c0_i32_0 = arith.constant 0 : i32
    %c0_i32_1 = arith.constant 0 : i32
    return %c0_i32, %c0_i32_0 : i32, i32
  }
  func.func @transform_1(%arg0: i32) -> (i32, i32) {
    %c0_i32 = arith.constant 0 : i32
    %c0_i32_0 = arith.constant 0 : i32
    %c0_i32_1 = arith.constant 0 : i32
    return %c0_i32, %c0_i32_0 : i32, i32
  }
  func.func @transform_2(%arg0: i32) -> (i32, i32) {
    %c0_i32 = arith.constant 0 : i32
    %c0_i32_0 = arith.constant 0 : i32
    %c0_i32_1 = arith.constant 0 : i32
    return %c0_i32, %c0_i32_0 : i32, i32
  }
  func.func @transform_3(%arg0: i32) -> (i32, i32) {
    %c0_i32 = arith.constant 0 : i32
    %c0_i32_0 = arith.constant 0 : i32
    %c0_i32_1 = arith.constant 0 : i32
    return %c0_i32, %c0_i32_0 : i32, i32
  }
  func.func @transform_4(%arg0: i32) -> (i32, i32) {
    %c0_i32 = arith.constant 0 : i32
    %c0_i32_0 = arith.constant 0 : i32
    %c0_i32_1 = arith.constant 0 : i32
    return %c0_i32, %c0_i32_0 : i32, i32
  }
  func.func @transform_5(%arg0: i32) -> (i32, i32) {
    %c0_i32 = arith.constant 0 : i32
    %c0_i32_0 = arith.constant 0 : i32
    %c0_i32_1 = arith.constant 0 : i32
    return %c0_i32, %c0_i32_0 : i32, i32
  }
  func.func @transform_6(%arg0: i32) -> (i32, i32) {
    %c0_i32 = arith.constant 0 : i32
    %c0_i32_0 = arith.constant 0 : i32
    %c0_i32_1 = arith.constant 0 : i32
    return %c0_i32, %c0_i32_0 : i32, i32
  }
  func.func @transform_7(%arg0: i32) -> (i32, i32, i32) {
    %c0_i32 = arith.constant 0 : i32
    %c0_i32_0 = arith.constant 0 : i32
    %c0_i32_1 = arith.constant 0 : i32
    %c0_i32_2 = arith.constant 0 : i32
    return %c0_i32, %c0_i32_0, %c0_i32_1 : i32, i32, i32
  }
  func.func @transform_8(%arg0: i32) -> (i32, i32, i32) {
    %c0_i32 = arith.constant 0 : i32
    %c0_i32_0 = arith.constant 0 : i32
    %c0_i32_1 = arith.constant 0 : i32
    %c0_i32_2 = arith.constant 0 : i32
    return %c0_i32, %c0_i32_0, %c0_i32_1 : i32, i32, i32
  }
  func.func @transform_9(%arg0: i32) -> (i32, i32) {
    %c0_i32 = arith.constant 0 : i32
    %c0_i32_0 = arith.constant 0 : i32
    %c0_i32_1 = arith.constant 0 : i32
    return %c0_i32, %c0_i32_0 : i32, i32
  }
  func.func @transform_10(%arg0: i32) -> (i32, i32) {
    %c0_i32 = arith.constant 0 : i32
    %c0_i32_0 = arith.constant 0 : i32
    %c0_i32_1 = arith.constant 0 : i32
    return %c0_i32, %c0_i32_0 : i32, i32
  }
  func.func @transform_11(%arg0: i32) -> (i32, i32) {
    %c0_i32 = arith.constant 0 : i32
    %c0_i32_0 = arith.constant 0 : i32
    %c0_i32_1 = arith.constant 0 : i32
    return %c0_i32, %c0_i32_0 : i32, i32
  }
}

</mosaic_0001>

<bundles_post_ra>
// kernel: lstm_nn_forward.1
= control target key start
LH: loop header
LB: loop body
LE: loop exit
PB: predicated region body
PF: predicated region fallthrough
CT: control target
= control target key end

     0   :  { %s3762_s0 = inlined_call_operand.vmem [shape: s32[16,1], index: 0, kind: input, shape index: {}]   ;;  %s3763_s1 = inlined_call_operand.hbm [shape: f32[50,128], index: 1, kind: input, shape index: {}]   ;;  %s3764_s2 = inlined_call_operand.vmem [shape: f32[32,128], index: 2, kind: input, shape index: {}]   ;;  %s3765_s3 = inlined_call_operand.vmem [shape: f32[1,128], index: 3, kind: input, shape index: {}]   ;;  %s3766_s4 = inlined_call_operand.hbm [shape: f32[32,128], index: 4, kind: input, shape index: {}]   ;;  %s3767_s5 = inlined_call_operand.hbm [shape: f32[32,128], index: 5, kind: input, shape index: {}]   ;;  %s3768_s6 = inlined_call_operand.hbm [shape: f32[1,128], index: 6, kind: input, shape index: {}]   ;;  %s3769_s7 = inlined_call_operand.vmem [shape: f32[2,2,32], index: 7, kind: input, shape index: {}]   ;;  %s3770_s8 = inlined_call_operand.vmem [shape: f32[2,2,32], index: 8, kind: input, shape index: {}]   ;;  %s3771_s9 = inlined_call_operand.vmem [shape: f32[1,32], index: 9, kind: input, shape index: {}]   ;;  %s3772_s10 = inlined_call_operand.<no memory space> [shape: f32[1,1], index: 10, kind: input, shape index: {}]   ;;  %s3773_s11 = inlined_call_operand.vmem [shape: f32[2,1], index: 11, kind: output, shape index: {}]  }
   0x1   :  { %v16_v0 = vstv %s3772_s10 }
   0x2   :  { %17 = vst [vmem:[#allocation2] sm:$0x1] %v16_v0 }
   0x3   :  { %18 = vsyncpa [#allocation4], 0 }
   0x4   :  { %19 = vsyncpa [#allocation6], 0 }
   0x5   :  { %20 = vsyncpa [#allocation9], 0  ;;  %s3196_s19 = smov [#allocation5]   ;;  %s3197_s21 = smov [#allocation3]  }
   0x6   :  { %s44_s20 = sshll.u32 %s3196_s19, 4  ;;  %s28_s22 = sshll.u32 %s3197_s21, 4  ;;  %s45_s20 = int_to_ptr.vmem [resolvable:$true] %s44_s20  ;;  %s29_s22 = int_to_ptr.vmem [resolvable:$true] %s28_s22 }
   0x7   :  { %s3118_s23 = scalar_lea.vmem %s45_s20, 512  ;;  %p3123_p1 = scmp.lt.s32.totalorder %s45_s20, %s45_s20 }
   0x8   :  { %p3119_p0 = scmp.ne.s32.totalorder %s45_s20, %s3118_s23  ;;  %p3124_p2 = scmp.lt.s32.totalorder %s3118_s23, %s3118_s23 }
   0xa   :  { %p3125_p3 = por %p3124_p2, %p3123_p1 }
   0xc   :  { %p3126_p4 = pnand %p3125_p3, %p3119_p0 }
   0xe   :  { %3129 = shalt.err (!%p3126_p4)
}
   0xf   :  { %s3198_s24 = smov 128   ;;  %s3199_s25 = smov 8  }
  0x10   :  { %50 = dma.hbm_to_vmem [thread:$0]  %s3766_s4, 512, %s45_s20, [#allocation6], %s3198_s24, %s3198_s24, %s3199_s25  }
  0x11   :  { %s3138_s27 = scalar_lea.vmem %s29_s22, 896  ;;  %p3143_p6 = scmp.lt.s32.totalorder %s29_s22, %s29_s22 }
  0x12   :  { %p3139_p5 = scmp.ne.s32.totalorder %s29_s22, %s3138_s27  ;;  %p3144_p7 = scmp.lt.s32.totalorder %s3138_s27, %s3138_s27 }
  0x14   :  { %p3145_p8 = por %p3144_p7, %p3143_p6 }
  0x16   :  { %p3146_p9 = pnand %p3145_p8, %p3139_p5 }
  0x18   :  { %3149 = shalt.err (!%p3146_p9)
}
  0x19   :  { %34 = dma.hbm_to_vmem [thread:$0]  %s3763_s1, 896, %s29_s22, [#allocation4], %s3198_s24, %s3198_s24, %s3199_s25  }
  0x1a   :  { %s3200_s30 = smov [#allocation7]   ;;  %s3201_s13 = smov [#allocation8]  }
  0x1b   :  { %s56_s12 = sshll.u32 %s3200_s30, 4  ;;  %s69_s14 = sshll.u32 %s3201_s13, 4  ;;  %s57_s12 = int_to_ptr.vmem [resolvable:$true] %s56_s12  ;;  %s70_s14 = int_to_ptr.vmem [resolvable:$true] %s69_s14 }
  0x1c   :  { %s3158_s15 = scalar_lea.vmem %s57_s12, 512  ;;  %p3163_p11 = scmp.lt.s32.totalorder %s57_s12, %s57_s12 }
  0x1d   :  { %p3159_p10 = scmp.ne.s32.totalorder %s57_s12, %s3158_s15  ;;  %p3164_p12 = scmp.lt.s32.totalorder %s3158_s15, %s3158_s15 }
  0x1f   :  { %p3165_p13 = por %p3164_p12, %p3163_p11 }
  0x21   :  { %p3166_p0 = pnand %p3165_p13, %p3159_p10 }
  0x23   :  { %3169 = shalt.err (!%p3166_p0)
}
  0x24   :  { %62 = dma.hbm_to_vmem [thread:$0]  %s3767_s5, 512, %s57_s12, [#allocation6], %s3198_s24, %s3198_s24, %s3199_s25  }
  0x25   :  { %s3178_s17 = scalar_lea.vmem %s70_s14, 16  ;;  %s3182_s1 = scalar_lea.vmem %s70_s14, 32 }
  0x26   :  { %p3179_p1 = scmp.ne.s32.totalorder %s70_s14, %s3178_s17  ;;  %p3183_p2 = scmp.lt.s32.totalorder %s70_s14, %s70_s14 }
  0x27   :  { %p3184_p3 = scmp.lt.s32.totalorder %s3182_s1, %s3178_s17 }
  0x29   :  { %p3185_p4 = por %p3184_p3, %p3183_p2 }
  0x2b   :  { %p3186_p5 = pnand %p3185_p4, %p3179_p1 }
  0x2d   :  { %3189 = shalt.err (!%p3186_p5)
}
  0x2e   :  { %72 = dma.hbm_to_vmem [thread:$0]  %s3768_s6, 16, %s70_s14, [#allocation9]  }
  0x2f   :  { %3190 = dma.done.wait [#allocation4], 896  }
  0x30   :  { %3191 = vsyncadd [#allocation4], 4294966400 }
  0x31   :  { %3192 = dma.done.wait [#allocation6], 1024  }
  0x32   :  { %3193 = vsyncadd [#allocation6], 4294966272 }
  0x33   :  { %3194 = dma.done.wait [#allocation9], 16  }
  0x34   :  { %3195 = vsyncadd [#allocation9], 4294967280  ;;  %v3202_v1 = vmov 0   ;;  %v3203_v2 = vmov 0.0   ;;  %vm130_vm0 = vcmask 1041408   ;;  %v93_v3 = vld [vmem:[%s3762_s0] sm:$0xff]  ;;  %v95_v17 = vlaneseq }
  0x35   :  { %2964 = vset.pattern.permute.xlu0 %v3202_v1  ;;  %2688 = vmatprep.subr.mxu1 %v3203_v2  ;;  %v115_v4 = vld [vmem:[#allocation3 + $0x30] sm:$0x3]  ;;  %v114_v5 = vld [vmem:[#allocation3 + $0x28] sm:$0xff]  ;;  %v113_v7 = vld [vmem:[#allocation3 + $0x20] sm:$0xff]  ;;  %vm219_vm1 = vcmask 261120   ;;  %vm3204_vm2 = vmmov 0  }
  0x36   :  { %98 = vperm.xlu0 %2964, %v93_v3   ;;  %2671 = vmatprep.subr.msk.mxu0 %vm130_vm0, %v115_v4  ;;  %v94_v6 = vld [vmem:[%s3762_s0 + $0x8] sm:$0xff]  ;;  %v3293_v8 = vld [vmem:[%s3764_s2 + $0x18] sm:$0xff]  ;;  %v3299_v9 = vld [vmem:[%s3764_s2 + $0x10] sm:$0xff]  ;;  %v96_v18 = vand.u32 127, %v95_v17  ;;  %vm123_vm3 = vcmask 408576   ;;  %s3205_s13 = smov 64  }
  0x37   :  { %2672 = vmatpush3.msk.msra.mxu0 %vm130_vm0, %v115_v4  ;;  %2689 = vmatpush3.msra.mxu1 %v3293_v8  ;;  %v112_v10 = vld [vmem:[#allocation3 + $0x18] sm:$0xff]  ;;  %v3305_v11 = vld [vmem:[%s3764_s2 + $0x8] sm:$0xff]  ;;  %v111_v12 = vld [vmem:[#allocation3 + $0x10] sm:$0xff]  ;;  %s3206_s4 = smov 32   ;;  %s3207_s23 = smov 96   ;;  %vm2463_vm6 = vcmask 254976  }
  0x38   :  { %2673 = vmatprep.subr.mxu0 %v114_v5  ;;  %2690 = vmatprep.subr.mxu1 %v3203_v2  ;;  %v3312_v13 = vld [vmem:[%s3764_s2] sm:$0xff]  ;;  %v110_v14 = vld [vmem:[#allocation3 + $0x8] sm:$0xff]  ;;  %v3348_v43 = vld [vmem:[#allocation7 + $0x18] sm:$0xff]  ;;  %vm2481_vm7 = vcmask 1024  }
  0x39   :  { %2674 = vmatpush3.msra.mxu0 %v114_v5  ;;  %2691 = vmatpush3.msra.mxu1 %v3299_v9  ;;  %v209_v15 = vld [vmem:[%s3769_s7] sm:$0x3]  ;;  %v3350_v44 = vld [vmem:[#allocation7 + $0x10] sm:$0xff]  ;;  %v3353_v45 = vld [vmem:[#allocation5 + $0x18] sm:$0xff] }
  0x3a   :  { %101 = vperm.xlu0 %2964, %v94_v6   ;;  %2675 = vmatprep.subr.mxu0 %v113_v7  ;;  %v109_v16 = vld [vmem:[#allocation3] sm:$0xff]  ;;  %v2492_v25 = vld [vmem:[%s3765_s3] ss:$0 sm:$0xff]  ;;  %v3359_v47 = vld [vmem:[#allocation5 + $0x10] sm:$0xff] }
  0x3b   :  { %2676 = vmatpush3.msra.mxu0 %v113_v7  ;;  %2692 = vmatprep.subr.mxu1 %v3203_v2  ;;  %v212_v32 = vld [vmem:[%s3770_s8] sm:$0x3]  ;;  %v2496_v50 = vld [vmem:[%s3769_s7 + $0x2] sm:$0x3]  ;;  %v3418_v59 = vld [vmem:[#allocation8] ss:$0 sm:$0xff] }
  0x3c   :  { %2677 = vmatprep.subr.mxu0 %v112_v10  ;;  %2693 = vmatpush3.msra.mxu1 %v3305_v11  ;;  %v3356_v46 = vld [vmem:[#allocation7 + $0x8] sm:$0xff]  ;;  %v3366_v49 = vld [vmem:[#allocation7] sm:$0xff] }
  0x3d   :  { %2678 = vmatpush3.msra.mxu0 %v112_v10  ;;  %2694 = vmatprep.subr.mxu1 %v3203_v2  ;;  %v3363_v48 = vld [vmem:[#allocation5 + $0x8] sm:$0xff]  ;;  %v3376_v51 = vld [vmem:[#allocation5] sm:$0xff] }
  0x3e   :  { %2679 = vmatprep.subr.mxu0 %v111_v12  ;;  %2695 = vmatpush3.msra.mxu1 %v3312_v13  ;;  %v2497_v6 = vld [vmem:[%s3770_s8 + $0x2] sm:$0x3] }
  0x3f   :  { %2680 = vmatpush3.msra.mxu0 %v111_v12  ;;  %2696 = vmatprep.mubr.msk.f32.mxu1 %vm3204_vm2, %v3203_v2 }
  0x40   :  { %2681 = vmatprep.subr.mxu0 %v110_v14  ;;  %2697 = vmatmul.mubr.msk.f32.vlgmr.msra.gmra.mxu1 %vm219_vm1, %v209_v15 }
  0x41   :  { %2682 = vmatpush3.msra.mxu0 %v110_v14  ;;  %2699 = vmatprep.subr.mxu1 %v3203_v2 }
  0x42   :  { %2683 = vmatprep.subr.mxu0 %v109_v16  ;;  %2707 = vmatprep.mubr.msk.f32.mxu1 %vm3204_vm2, %v3203_v2 }
  0x43   :  { %2684 = vmatpush3.msra.mxu0 %v109_v16  ;;  %2700 = vmatpush3.msra.mxu1 %v3348_v43 }
  0x44   :  { %2710 = vmatprep.subr.mxu0 %v3203_v2  ;;  %2701 = vmatprep.subr.mxu1 %v3203_v2 }
  0x45   :  { %2702 = vmatpush3.msra.mxu1 %v3350_v44 }
  0x46   :  { %2703 = vmatprep.subr.mxu1 %v3203_v2 }
  0x47   :  { %2704 = vmatpush3.msra.mxu1 %v3356_v46 }
  0x48   :  { %2705 = vmatprep.subr.mxu1 %v3203_v2 }
  0x49   :  { %2706 = vmatpush3.msra.mxu1 %v3366_v49 }
  0x4a   :  { %2708 = vmatmul.mubr.msk.f32.vlgmr.msra.gmra.mxu1 %vm219_vm1, %v2496_v50  ;;  %2721 = vmatprep.subr.mxu1 %v3203_v2 }
  0x4b   :  { %2722 = vmatpush3.msra.mxu1 %v3293_v8  ;;  %2729 = vmatprep.mubr.msk.f32.mxu1 %vm3204_vm2, %v3203_v2 }
  0x4c   :  { %2723 = vmatprep.subr.mxu1 %v3203_v2 }
  0x4d   :  { %2724 = vmatpush3.msra.mxu1 %v3299_v9 }
  0x4e   :  { %2725 = vmatprep.subr.mxu1 %v3203_v2 }
  0x4f   :  { %2726 = vmatpush3.msra.mxu1 %v3305_v11 }
  0x50   :  { %2727 = vmatprep.subr.mxu1 %v3203_v2 }
  0x51   :  { %2728 = vmatpush3.msra.mxu1 %v3312_v13 }
  0x52   :  { %2743 = vmatprep.subr.mxu1 %v3203_v2 }
  0xb1   :  { %v99_v19 = vpop.permute.xlu0 %98 }
  0xb2   :  { %vm103_vm4 = vcmp.eq.s32.totalorder %v96_v18, %v99_v19 }
  0xb3   :  { %v2490_v20 = vsel %vm103_vm4, 1.0, %v3203_v2 }
  0xb4   :  { %2685 = vmatprep.mubr.msk.f32.mxu0 %vm123_vm3, %v2490_v20 }
  0xb5   :  { %v102_v21 = vpop.permute.xlu0 %101 }
  0xb6   :  { %vm104_vm5 = vcmp.eq.s32.totalorder %v96_v18, %v102_v21 }
  0xb7   :  { %v2491_v22 = vsel %vm104_vm5, 1.0, %v3203_v2 }
  0xb8   :  { %2686 = vmatmul.mubr.msk.f32.vlgmr.msra.gmra.mxu0 %vm123_vm3, %v2491_v22 }
  0xb9   :  { %2718 = vmatprep.mubr.msk.f32.mxu0 %vm3204_vm2, %v3203_v2  ;;  %2711 = vmatpush3.msra.mxu0 %v3353_v45 }
  0xba   :  { %2712 = vmatprep.subr.mxu0 %v3203_v2 }
  0xbb   :  { %2713 = vmatpush3.msra.mxu0 %v3359_v47 }
  0xbc   :  { %2714 = vmatprep.subr.mxu0 %v3203_v2 }
  0xbd   :  { %2715 = vmatpush3.msra.mxu0 %v3363_v48 }
  0xbe   :  { %2716 = vmatprep.subr.mxu0 %v3203_v2 }
  0xbf   :  { %2717 = vmatpush3.msra.mxu0 %v3376_v51 }
  0xc0   :  { %2732 = vmatprep.subr.mxu0 %v3203_v2 }
 0x100   :  { %v289_v23 = vpop.f32.mrf.mxu1 }
 0x102   :  { %v2698_v24 = vpop.f32.mrf.mxu1 }
 0x10a   :  { %v399_v55 = vpop.f32.mrf.mxu1 }
 0x10c   :  { %v2709_v56 = vpop.f32.mrf.mxu1 }
 0x178   :  { %v2687_v26 = vpop.f32.mrf.mxu0 }
 0x179   :  { %v3334_v27 = vadd.f32 %v2687_v26, %v2492_v25 }
 0x17a   :  { %v200_v28 = vpop.f32.mrf.mxu0 }
 0x17b   :  { %v3336_v29 = vadd.f32 %v2492_v25, %v200_v28 }
 0x17d   :  { %v293_v30 = vadd.f32 %v289_v23, %v3336_v29 }
 0x17f   :  { %2965 = vtanh.f32 %v293_v30  ;;  %v2499_v33 = vmul.f32 -1.442695, %v293_v30 }
 0x181   :  { %2967 = vpow2.f32 %v2499_v33 }
 0x18c   :  { %v2966_v31 = vpop.eup %2965 }
 0x18d   :  { %307 = vrot.lane.b32.xlu1 %v2966_v31, %s3205_s13 }
 0x18e   :  { %v2968_v34 = vpop.eup %2967 }
 0x18f   :  { %v297_v35 = vadd.f32 1.0, %v2968_v34 }
 0x191   :  { %302 = vrot.lane.b32.xlu1 %v212_v32, %s3206_s4  ;;  %2969 = vrcp.f32 %v297_v35 }
 0x19e   :  { %v2970_v36 = vpop.eup %2969 }
 0x1ff   :  { %v308_v37 = vpop.permute.xlu1 %307 }
 0x200   :  { %v310_v38 = vmul.f32 %v2970_v36, %v308_v37 }
 0x202   :  { %312 = vrot.lane.b32.xlu0 %v310_v38, %s3206_s4 }
 0x203   :  { %v303_v39 = vpop.permute.xlu1 %302 }
 0x204   :  { %v305_v40 = vmul.f32 %v2970_v36, %v303_v39 }
 0x274   :  { %v313_v41 = vpop.permute.xlu0 %312 }
 0x275   :  { %v3345_v42 = vadd.f32 %v313_v41, %v305_v40 }
 0x277   :  { %2971 = vtanh.f32 %v3345_v42  ;;  %v596_v24 = vrot.slane %v3345_v42, 6 }
 0x284   :  { %v2972_v52 = vpop.eup %2971 }
 0x285   :  { %318 = vrot.lane.b32.xlu1 %v2972_v52, %s3205_s13 }
 0x2f7   :  { %v319_v53 = vpop.permute.xlu1 %318 }
 0x2f8   :  { %v321_v54 = vmul.f32 %v2970_v36, %v319_v53 }
 0x2fa   :  { %404 = vrot.lane.b32.xlu0 %v321_v54, %s3206_s4 }
 0x36c   :  { %v405_v57 = vpop.permute.xlu0 %404 }
 0x36d   :  { %2719 = vmatmul.mubr.msk.f32.vlgmr.msra.gmra.mxu0 %vm219_vm1, %v405_v57  ;;  %2730 = vmatmul.mubr.msk.f32.vlgmr.msra.gmra.mxu1 %vm219_vm1, %v405_v57 }
 0x36e   :  { %2733 = vmatpush3.msra.mxu0 %v3348_v43  ;;  %2744 = vmatpush3.msra.mxu1 %v3353_v45 }
 0x36f   :  { %2734 = vmatprep.subr.mxu0 %v3203_v2  ;;  %2745 = vmatprep.subr.mxu1 %v3203_v2 }
 0x370   :  { %2735 = vmatpush3.msra.mxu0 %v3350_v44  ;;  %2746 = vmatpush3.msra.mxu1 %v3359_v47 }
 0x371   :  { %2736 = vmatprep.subr.mxu0 %v3203_v2  ;;  %2747 = vmatprep.subr.mxu1 %v3203_v2 }
 0x372   :  { %2737 = vmatpush3.msra.mxu0 %v3356_v46  ;;  %2740 = vmatprep.mubr.msk.f32.mxu0 %vm3204_vm2, %v3203_v2 }
 0x373   :  { %2738 = vmatprep.subr.mxu0 %v3203_v2  ;;  %2748 = vmatpush3.msra.mxu1 %v3363_v48 }
 0x374   :  { %2739 = vmatpush3.msra.mxu0 %v3366_v49  ;;  %2749 = vmatprep.subr.mxu1 %v3203_v2 }
 0x375   :  { %2754 = vmatprep.subr.mxu0 %v3203_v2  ;;  %2750 = vmatpush3.msra.mxu1 %v3376_v51 }
 0x376   :  { %2751 = vmatprep.mubr.msk.f32.mxu1 %vm3204_vm2, %v3203_v2  ;;  %2765 = vmatprep.subr.mxu1 %v3203_v2 }
 0x42d   :  { %v474_v58 = vpop.f32.mrf.mxu0  ;;  %v580_v60 = vpop.f32.mrf.mxu1 }
 0x42e   :  { %v475_v61 = vadd.f32 %v474_v58, %v399_v55  ;;  %v585_v62 = vrot.slane %v580_v60, 6 }
 0x42f   :  { %v2720_v63 = vpop.f32.mrf.mxu0  ;;  %v2731_v0 = vpop.f32.mrf.mxu1 }
 0x430   :  { %v485_v1 = vadd.f32 %v3418_v59, %v475_v61  ;;  %v587_v3 = vadd.f32 %v585_v62, %v3336_v29 }
 0x432   :  { %2973 = vtanh.f32 %v485_v1  ;;  %v2503_v7 = vmul.f32 -1.442695, %v485_v1  ;;  %v2505_v10 = vmul.f32 -1.442695, %v587_v3 }
 0x433   :  { %2975 = vtanh.f32 %v587_v3 }
 0x434   :  { %2977 = vpow2.f32 %v2503_v7 }
 0x435   :  { %2979 = vpow2.f32 %v2505_v10 }
 0x43f   :  { %v2974_v4 = vpop.eup %2973 }
 0x440   :  { %v2976_v5 = vpop.eup %2975  ;;  %499 = vrot.lane.b32.xlu1 %v2974_v4, %s3205_s13 }
 0x441   :  { %600 = vrot.lane.b32.xlu0 %v2976_v5, %s3205_s13  ;;  %v2978_v12 = vpop.eup %2977 }
 0x442   :  { %v2980_v14 = vpop.eup %2979  ;;  %v489_v15 = vadd.f32 1.0, %v2978_v12 }
 0x443   :  { %v591_v16 = vadd.f32 1.0, %v2980_v14 }
 0x444   :  { %494 = vrot.lane.b32.xlu1 %v2497_v6, %s3206_s4  ;;  %2981 = vrcp.f32 %v489_v15 }
 0x445   :  { %2983 = vrcp.f32 %v591_v16 }
 0x451   :  { %v2982_v17 = vpop.eup %2981 }
 0x452   :  { %v2984_v19 = vpop.eup %2983 }
 0x453   :  { %v598_v26 = vmul.f32 %v2984_v19, %v596_v24 }
 0x4b2   :  { %v500_v18 = vpop.permute.xlu1 %499 }
 0x4b3   :  { %v601_v20 = vpop.permute.xlu0 %600  ;;  %v502_v21 = vmul.f32 %v2982_v17, %v500_v18 }
 0x4b4   :  { %v603_v22 = vmul.f32 %v2984_v19, %v601_v20 }
 0x4b5   :  { %504 = vrot.lane.b32.xlu0 %v502_v21, %s3206_s4 }
 0x4b6   :  { %605 = vrot.lane.b32.xlu1 %v603_v22, %s3206_s4  ;;  %v495_v23 = vpop.permute.xlu1 %494 }
 0x4b7   :  { %v497_v25 = vmul.f32 %v2982_v17, %v495_v23 }
 0x527   :  { %v505_v28 = vpop.permute.xlu0 %504 }
 0x528   :  { %v606_v30 = vpop.permute.xlu1 %605  ;;  %v3431_v31 = vadd.f32 %v505_v28, %v497_v25 }
 0x529   :  { %v3433_v32 = vadd.f32 %v606_v30, %v598_v26 }
 0x52a   :  { %2985 = vtanh.f32 %v3431_v31 }
 0x52b   :  { %2987 = vtanh.f32 %v3433_v32 }
 0x537   :  { %v2986_v33 = vpop.eup %2985 }
 0x538   :  { %v2988_v34 = vpop.eup %2987  ;;  %510 = vrot.lane.b32.xlu0 %v2986_v33, %s3205_s13 }
 0x539   :  { %611 = vrot.lane.b32.xlu1 %v2988_v34, %s3205_s13 }
 0x5aa   :  { %v511_v35 = vpop.permute.xlu0 %510 }
 0x5ab   :  { %v612_v36 = vpop.permute.xlu1 %611  ;;  %v513_v37 = vmul.f32 %v2982_v17, %v511_v35 }
 0x5ac   :  { %v614_v38 = vmul.f32 %v2984_v19, %v612_v36  ;;  %v873_v19 = vrot.slane %v3433_v32, 6 }
 0x5ad   :  { %616 = vrot.lane.b32.xlu0 %v513_v37, %s3206_s4 }
 0x5ae   :  { %v691_v39 = vrot.slane %v614_v38, 2 }
 0x5b0   :  { %692 = vrot.lane.b32.xlu1 %v691_v39, %s3206_s4 }
 0x61f   :  { %v617_v40 = vpop.permute.xlu0 %616 }
 0x620   :  { %2741 = vmatmul.mubr.msk.f32.vlgmr.msra.gmra.mxu0 %vm219_vm1, %v617_v40 }
 0x621   :  { %2755 = vmatpush3.msra.mxu0 %v3293_v8  ;;  %2762 = vmatprep.mubr.msk.f32.mxu0 %vm3204_vm2, %v3203_v2 }
 0x622   :  { %v693_v41 = vpop.permute.xlu1 %692  ;;  %2756 = vmatprep.subr.mxu0 %v3203_v2 }
 0x623   :  { %2752 = vmatmul.mubr.msk.f32.vlgmr.msra.gmra.mxu1 %vm219_vm1, %v693_v41  ;;  %2757 = vmatpush3.msra.mxu0 %v3299_v9 }
 0x624   :  { %2758 = vmatprep.subr.mxu0 %v3203_v2  ;;  %2766 = vmatpush3.msra.mxu1 %v3348_v43 }
 0x625   :  { %2759 = vmatpush3.msra.mxu0 %v3305_v11  ;;  %2767 = vmatprep.subr.mxu1 %v3203_v2 }
 0x626   :  { %2760 = vmatprep.subr.mxu0 %v3203_v2  ;;  %2768 = vmatpush3.msra.mxu1 %v3350_v44 }
 0x627   :  { %2761 = vmatpush3.msra.mxu0 %v3312_v13  ;;  %2769 = vmatprep.subr.mxu1 %v3203_v2 }
 0x628   :  { %2763 = vmatmul.mubr.msk.f32.vlgmr.msra.gmra.mxu0 %vm219_vm1, %v693_v41  ;;  %2770 = vmatpush3.msra.mxu1 %v3356_v46 }
 0x629   :  { %2771 = vmatprep.subr.mxu1 %v3203_v2  ;;  %2773 = vmatprep.mubr.msk.f32.mxu1 %vm3204_vm2, %v3203_v2 }
 0x62a   :  { %2772 = vmatpush3.msra.mxu1 %v3366_v49  ;;  %2776 = vmatprep.subr.mxu0 %v3203_v2 }
 0x62b   :  { %2787 = vmatprep.subr.mxu1 %v3203_v2  ;;  %2777 = vmatpush3.msra.mxu0 %v3353_v45 }
 0x62c   :  { %2778 = vmatprep.subr.mxu0 %v3203_v2  ;;  %2784 = vmatprep.mubr.msk.f32.mxu0 %vm3204_vm2, %v3203_v2 }
 0x62d   :  { %2779 = vmatpush3.msra.mxu0 %v3359_v47 }
 0x62e   :  { %2780 = vmatprep.subr.mxu0 %v3203_v2 }
 0x62f   :  { %2781 = vmatpush3.msra.mxu0 %v3363_v48 }
 0x630   :  { %2782 = vmatprep.subr.mxu0 %v3203_v2 }
 0x631   :  { %2783 = vmatpush3.msra.mxu0 %v3376_v51 }
 0x632   :  { %2798 = vmatprep.subr.mxu0 %v3203_v2 }
 0x6e0   :  { %v686_v42 = vpop.f32.mrf.mxu0 }
 0x6e2   :  { %v2742_v50 = vpop.f32.mrf.mxu0 }
 0x6e3   :  { %v762_v52 = vpop.f32.mrf.mxu1 }
 0x6e4   :  { %v763_v53 = vadd.f32 %v762_v52, %v686_v42 }
 0x6e5   :  { %v2753_v54 = vpop.f32.mrf.mxu1 }
 0x6e6   :  { %v766_v55 = vadd.f32 %v3418_v59, %v763_v53 }
 0x6e8   :  { %2989 = vtanh.f32 %v766_v55  ;;  %v857_v56 = vpop.f32.mrf.mxu0  ;;  %v2508_v63 = vmul.f32 -1.442695, %v766_v55 }
 0x6e9   :  { %v862_v57 = vrot.slane %v857_v56, 4 }
 0x6ea   :  { %v2764_v58 = vpop.f32.mrf.mxu0 }
 0x6eb   :  { %v864_v60 = vadd.f32 %v862_v57, %v3336_v29 }
 0x6ed   :  { %2991 = vtanh.f32 %v864_v60  ;;  %v2510_v0 = vmul.f32 -1.442695, %v864_v60 }
 0x6ee   :  { %2993 = vpow2.f32 %v2508_v63 }
 0x6ef   :  { %2995 = vpow2.f32 %v2510_v0 }
 0x6f5   :  { %v2990_v61 = vpop.eup %2989 }
 0x6f6   :  { %776 = vrot.lane.b32.xlu0 %v2990_v61, %s3205_s13 }
 0x6fa   :  { %v2992_v62 = vpop.eup %2991 }
 0x6fb   :  { %877 = vrot.lane.b32.xlu1 %v2992_v62, %s3205_s13  ;;  %v2994_v1 = vpop.eup %2993 }
 0x6fc   :  { %v770_v3 = vadd.f32 1.0, %v2994_v1  ;;  %v2996_v4 = vpop.eup %2995 }
 0x6fd   :  { %v868_v5 = vadd.f32 1.0, %v2996_v4 }
 0x6fe   :  { %2997 = vrcp.f32 %v770_v3 }
 0x6ff   :  { %2999 = vrcp.f32 %v868_v5 }
 0x70b   :  { %v2998_v6 = vpop.eup %2997 }
 0x70c   :  { %v3000_v12 = vpop.eup %2999  ;;  %v774_v16 = vmul.f32 %v2998_v6, %v3431_v31 }
 0x70d   :  { %v875_v20 = vmul.f32 %v3000_v12, %v873_v19 }
 0x768   :  { %v777_v7 = vpop.permute.xlu0 %776 }
 0x769   :  { %v779_v10 = vmul.f32 %v2998_v6, %v777_v7 }
 0x76b   :  { %781 = vrot.lane.b32.xlu0 %v779_v10, %s3206_s4 }
 0x76d   :  { %v878_v14 = vpop.permute.xlu1 %877 }
 0x76e   :  { %v880_v15 = vmul.f32 %v3000_v12, %v878_v14 }
 0x770   :  { %882 = vrot.lane.b32.xlu1 %v880_v15, %s3206_s4 }
 0x7dd   :  { %v782_v17 = vpop.permute.xlu0 %781 }
 0x7de   :  { %v3481_v18 = vadd.f32 %v782_v17, %v774_v16 }
 0x7e0   :  { %3001 = vtanh.f32 %v3481_v18 }
 0x7e2   :  { %v883_v21 = vpop.permute.xlu1 %882 }
 0x7e3   :  { %v3485_v22 = vadd.f32 %v883_v21, %v875_v20 }
 0x7e5   :  { %3003 = vtanh.f32 %v3485_v22  ;;  %v1150_v3 = vrot.slane %v3485_v22, 6 }
 0x7ed   :  { %v3002_v23 = vpop.eup %3001 }
 0x7ee   :  { %787 = vrot.lane.b32.xlu0 %v3002_v23, %s3205_s13 }
 0x7f2   :  { %v3004_v24 = vpop.eup %3003 }
 0x7f3   :  { %888 = vrot.lane.b32.xlu1 %v3004_v24, %s3205_s13 }
 0x860   :  { %v788_v25 = vpop.permute.xlu0 %787 }
 0x861   :  { %v790_v26 = vmul.f32 %v2998_v6, %v788_v25 }
 0x863   :  { %893 = vrot.lane.b32.xlu0 %v790_v26, %s3206_s4 }
 0x865   :  { %v889_v28 = vpop.permute.xlu1 %888 }
 0x866   :  { %v891_v30 = vmul.f32 %v3000_v12, %v889_v28 }
 0x868   :  { %v968_v31 = vrot.slane %v891_v30, 4 }
 0x86a   :  { %969 = vrot.lane.b32.xlu1 %v968_v31, %s3206_s4 }
 0x8d5   :  { %v894_v32 = vpop.permute.xlu0 %893 }
 0x8d6   :  { %2774 = vmatmul.mubr.msk.f32.vlgmr.msra.gmra.mxu1 %vm219_vm1, %v894_v32 }
 0x8d7   :  { %2788 = vmatpush3.msra.mxu1 %v3293_v8  ;;  %2795 = vmatprep.mubr.msk.f32.mxu1 %vm3204_vm2, %v3203_v2 }
 0x8d8   :  { %2789 = vmatprep.subr.mxu1 %v3203_v2 }
 0x8d9   :  { %2790 = vmatpush3.msra.mxu1 %v3299_v9 }
 0x8da   :  { %2791 = vmatprep.subr.mxu1 %v3203_v2 }
 0x8db   :  { %2792 = vmatpush3.msra.mxu1 %v3305_v11 }
 0x8dc   :  { %2793 = vmatprep.subr.mxu1 %v3203_v2  ;;  %v970_v33 = vpop.permute.xlu1 %969 }
 0x8dd   :  { %2794 = vmatpush3.msra.mxu1 %v3312_v13  ;;  %2785 = vmatmul.mubr.msk.f32.vlgmr.msra.gmra.mxu0 %vm219_vm1, %v970_v33 }
 0x8de   :  { %2796 = vmatmul.mubr.msk.f32.vlgmr.msra.gmra.mxu1 %vm219_vm1, %v970_v33  ;;  %2799 = vmatpush3.msra.mxu0 %v3348_v43 }
 0x8df   :  { %2800 = vmatprep.subr.mxu0 %v3203_v2  ;;  %2809 = vmatprep.subr.mxu1 %v3203_v2 }
 0x8e0   :  { %2801 = vmatpush3.msra.mxu0 %v3350_v44  ;;  %2810 = vmatpush3.msra.mxu1 %v3353_v45 }
 0x8e1   :  { %2802 = vmatprep.subr.mxu0 %v3203_v2  ;;  %2811 = vmatprep.subr.mxu1 %v3203_v2 }
 0x8e2   :  { %2803 = vmatpush3.msra.mxu0 %v3356_v46  ;;  %2812 = vmatpush3.msra.mxu1 %v3359_v47 }
 0x8e3   :  { %2804 = vmatprep.subr.mxu0 %v3203_v2  ;;  %2813 = vmatprep.subr.mxu1 %v3203_v2 }
 0x8e4   :  { %2805 = vmatpush3.msra.mxu0 %v3366_v49  ;;  %2806 = vmatprep.mubr.msk.f32.mxu0 %vm3204_vm2, %v3203_v2 }
 0x8e5   :  { %2814 = vmatpush3.msra.mxu1 %v3363_v48  ;;  %2820 = vmatprep.subr.mxu0 %v3203_v2 }
 0x8e6   :  { %2815 = vmatprep.subr.mxu1 %v3203_v2  ;;  %2817 = vmatprep.mubr.msk.f32.mxu1 %vm3204_vm2, %v3203_v2 }
 0x8e7   :  { %2816 = vmatpush3.msra.mxu1 %v3376_v51 }
 0x8e8   :  { %2831 = vmatprep.subr.mxu1 %v3203_v2 }
 0x996   :  { %v963_v34 = vpop.f32.mrf.mxu1 }
 0x998   :  { %v2775_v35 = vpop.f32.mrf.mxu1 }
 0x99d   :  { %v1039_v36 = vpop.f32.mrf.mxu0 }
 0x99e   :  { %v1040_v37 = vadd.f32 %v1039_v36, %v963_v34  ;;  %v1134_v38 = vpop.f32.mrf.mxu1 }
 0x99f   :  { %v1139_v39 = vrot.slane %v1134_v38, 2  ;;  %v2786_v40 = vpop.f32.mrf.mxu0 }
 0x9a0   :  { %v1043_v41 = vadd.f32 %v3418_v59, %v1040_v37  ;;  %v2797_v42 = vpop.f32.mrf.mxu1 }
 0x9a1   :  { %v1141_v50 = vadd.f32 %v1139_v39, %v3336_v29 }
 0x9a2   :  { %3005 = vtanh.f32 %v1043_v41  ;;  %v2513_v54 = vmul.f32 -1.442695, %v1043_v41 }
 0x9a3   :  { %3007 = vtanh.f32 %v1141_v50  ;;  %v2515_v55 = vmul.f32 -1.442695, %v1141_v50 }
 0x9a4   :  { %3009 = vpow2.f32 %v2513_v54 }
 0x9a5   :  { %3011 = vpow2.f32 %v2515_v55 }
 0x9af   :  { %v3006_v52 = vpop.eup %3005 }
 0x9b0   :  { %v3008_v53 = vpop.eup %3007  ;;  %1053 = vrot.lane.b32.xlu1 %v3006_v52, %s3205_s13 }
 0x9b1   :  { %1154 = vrot.lane.b32.xlu0 %v3008_v53, %s3205_s13  ;;  %v3010_v56 = vpop.eup %3009 }
 0x9b2   :  { %v3012_v57 = vpop.eup %3011  ;;  %v1047_v58 = vadd.f32 1.0, %v3010_v56 }
 0x9b3   :  { %v1145_v60 = vadd.f32 1.0, %v3012_v57 }
 0x9b4   :  { %3013 = vrcp.f32 %v1047_v58 }
 0x9b5   :  { %3015 = vrcp.f32 %v1145_v60 }
 0x9c1   :  { %v3014_v61 = vpop.eup %3013 }
 0x9c2   :  { %v3016_v62 = vpop.eup %3015  ;;  %v1051_v4 = vmul.f32 %v3014_v61, %v3481_v18 }
 0x9c3   :  { %v1152_v5 = vmul.f32 %v3016_v62, %v1150_v3 }
 0xa22   :  { %v1054_v29 = vpop.permute.xlu1 %1053 }
 0xa23   :  { %v1155_v63 = vpop.permute.xlu0 %1154  ;;  %v1056_v0 = vmul.f32 %v3014_v61, %v1054_v29 }
 0xa24   :  { %v1157_v1 = vmul.f32 %v3016_v62, %v1155_v63 }
 0xa25   :  { %1058 = vrot.lane.b32.xlu1 %v1056_v0, %s3206_s4 }
 0xa26   :  { %1159 = vrot.lane.b32.xlu0 %v1157_v1, %s3206_s4 }
 0xa97   :  { %v1059_v6 = vpop.permute.xlu1 %1058 }
 0xa98   :  { %v1160_v7 = vpop.permute.xlu0 %1159  ;;  %v3533_v10 = vadd.f32 %v1059_v6, %v1051_v4 }
 0xa99   :  { %v3535_v12 = vadd.f32 %v1160_v7, %v1152_v5 }
 0xa9a   :  { %3017 = vtanh.f32 %v3533_v10 }
 0xa9b   :  { %3019 = vtanh.f32 %v3535_v12  ;;  %v1424_v57 = vrot.slane %v3535_v12, 6 }
 0xaa7   :  { %v3018_v14 = vpop.eup %3017 }
 0xaa8   :  { %v3020_v15 = vpop.eup %3019  ;;  %1064 = vrot.lane.b32.xlu1 %v3018_v14, %s3205_s13 }
 0xaa9   :  { %1165 = vrot.lane.b32.xlu0 %v3020_v15, %s3205_s13 }
 0xb1a   :  { %v1065_v16 = vpop.permute.xlu1 %1064 }
 0xb1b   :  { %v1166_v17 = vpop.permute.xlu0 %1165  ;;  %v1067_v18 = vmul.f32 %v3014_v61, %v1065_v16 }
 0xb1c   :  { %v1168_v19 = vmul.f32 %v3016_v62, %v1166_v17 }
 0xb1d   :  { %1170 = vrot.lane.b32.xlu0 %v1067_v18, %s3206_s4 }
 0xb1e   :  { %v1245_v20 = vrot.slane %v1168_v19, 6 }
 0xb20   :  { %1246 = vrot.lane.b32.xlu1 %v1245_v20, %s3206_s4 }
 0xb8f   :  { %v1171_v21 = vpop.permute.xlu0 %1170 }
 0xb90   :  { %2807 = vmatmul.mubr.msk.f32.vlgmr.msra.gmra.mxu0 %vm219_vm1, %v1171_v21 }
 0xb91   :  { %2821 = vmatpush3.msra.mxu0 %v3293_v8  ;;  %2828 = vmatprep.mubr.msk.f32.mxu0 %vm3204_vm2, %v3203_v2 }
 0xb92   :  { %2822 = vmatprep.subr.mxu0 %v3203_v2  ;;  %v1247_v22 = vpop.permute.xlu1 %1246 }
 0xb93   :  { %2818 = vmatmul.mubr.msk.f32.vlgmr.msra.gmra.mxu1 %vm219_vm1, %v1247_v22  ;;  %2823 = vmatpush3.msra.mxu0 %v3299_v9 }
 0xb94   :  { %2824 = vmatprep.subr.mxu0 %v3203_v2  ;;  %2832 = vmatpush3.msra.mxu1 %v3348_v43 }
 0xb95   :  { %2825 = vmatpush3.msra.mxu0 %v3305_v11  ;;  %2833 = vmatprep.subr.mxu1 %v3203_v2 }
 0xb96   :  { %2826 = vmatprep.subr.mxu0 %v3203_v2  ;;  %2834 = vmatpush3.msra.mxu1 %v3350_v44 }
 0xb97   :  { %2827 = vmatpush3.msra.mxu0 %v3312_v13  ;;  %2835 = vmatprep.subr.mxu1 %v3203_v2 }
 0xb98   :  { %2829 = vmatmul.mubr.msk.f32.vlgmr.msra.gmra.mxu0 %vm219_vm1, %v1247_v22  ;;  %2842 = vmatprep.subr.mxu0 %v3203_v2 }
 0xb99   :  { %2836 = vmatpush3.msra.mxu1 %v3356_v46  ;;  %2843 = vmatpush3.msra.mxu0 %v3353_v45 }
 0xb9a   :  { %2837 = vmatprep.subr.mxu1 %v3203_v2  ;;  %2844 = vmatprep.subr.mxu0 %v3203_v2 }
 0xb9b   :  { %2838 = vmatpush3.msra.mxu1 %v3366_v49  ;;  %2845 = vmatpush3.msra.mxu0 %v3359_v47 }
 0xb9c   :  { %2839 = vmatprep.mubr.msk.f32.mxu1 %vm3204_vm2, %v3203_v2  ;;  %2846 = vmatprep.subr.mxu0 %v3203_v2 }
 0xb9d   :  { %2853 = vmatprep.subr.mxu1 %v3203_v2  ;;  %2847 = vmatpush3.msra.mxu0 %v3363_v48 }
 0xb9e   :  { %2848 = vmatprep.subr.mxu0 %v3203_v2  ;;  %2850 = vmatprep.mubr.msk.f32.mxu0 %vm3204_vm2, %v3203_v2 }
 0xb9f   :  { %2849 = vmatpush3.msra.mxu0 %v3376_v51 }
 0xba0   :  { %2864 = vmatprep.subr.mxu0 %v3203_v2 }
 0xc50   :  { %v1240_v23 = vpop.f32.mrf.mxu0 }
 0xc52   :  { %v2808_v24 = vpop.f32.mrf.mxu0 }
 0xc53   :  { %v1316_v25 = vpop.f32.mrf.mxu1 }
 0xc54   :  { %v1317_v26 = vadd.f32 %v1316_v25, %v1240_v23 }
 0xc55   :  { %v2819_v28 = vpop.f32.mrf.mxu1 }
 0xc56   :  { %v1320_v30 = vadd.f32 %v3418_v59, %v1317_v26 }
 0xc58   :  { %3021 = vtanh.f32 %v1320_v30  ;;  %v1411_v31 = vpop.f32.mrf.mxu0  ;;  %v2518_v36 = vmul.f32 -1.442695, %v1320_v30 }
 0xc59   :  { %v1415_v32 = vadd.f32 %v1411_v31, %v3334_v27 }
 0xc5a   :  { %v2830_v33 = vpop.f32.mrf.mxu0 }
 0xc5b   :  { %3023 = vtanh.f32 %v1415_v32  ;;  %v2520_v37 = vmul.f32 -1.442695, %v1415_v32 }
 0xc5c   :  { %3025 = vpow2.f32 %v2518_v36 }
 0xc5d   :  { %3027 = vpow2.f32 %v2520_v37 }
 0xc65   :  { %v3022_v34 = vpop.eup %3021 }
 0xc66   :  { %1330 = vrot.lane.b32.xlu0 %v3022_v34, %s3205_s13 }
 0xc68   :  { %v3024_v35 = vpop.eup %3023 }
 0xc69   :  { %1428 = vrot.lane.b32.xlu1 %v3024_v35, %s3205_s13  ;;  %v3026_v38 = vpop.eup %3025 }
 0xc6a   :  { %v3028_v39 = vpop.eup %3027  ;;  %v1324_v40 = vadd.f32 1.0, %v3026_v38 }
 0xc6b   :  { %v1419_v41 = vadd.f32 1.0, %v3028_v39 }
 0xc6c   :  { %3029 = vrcp.f32 %v1324_v40 }
 0xc6d   :  { %3031 = vrcp.f32 %v1419_v41 }
 0xc79   :  { %v3030_v42 = vpop.eup %3029 }
 0xc7a   :  { %v3032_v53 = vpop.eup %3031  ;;  %v1328_v56 = vmul.f32 %v3030_v42, %v3533_v10 }
 0xc7b   :  { %v1426_v61 = vmul.f32 %v3032_v53, %v1424_v57  ;;  %v3649_v57 = vld [vmem:[%s3764_s2 + $0x18] sm:$0xff] }
 0xcd8   :  { %v1331_v50 = vpop.permute.xlu0 %1330 }
 0xcd9   :  { %v1333_v52 = vmul.f32 %v3030_v42, %v1331_v50 }
 0xcdb   :  { %1335 = vrot.lane.b32.xlu0 %v1333_v52, %s3206_s4  ;;  %v1429_v54 = vpop.permute.xlu1 %1428 }
 0xcdc   :  { %v1431_v55 = vmul.f32 %v3032_v53, %v1429_v54 }
 0xcde   :  { %1433 = vrot.lane.b32.xlu1 %v1431_v55, %s3206_s4 }
 0xd4d   :  { %v1336_v58 = vpop.permute.xlu0 %1335 }
 0xd4e   :  { %v3584_v60 = vadd.f32 %v1336_v58, %v1328_v56  ;;  %v3658_v58 = vld [vmem:[%s3764_s2 + $0x10] sm:$0xff] }
 0xd50   :  { %3033 = vtanh.f32 %v3584_v60  ;;  %v1434_v29 = vpop.permute.xlu1 %1433 }
 0xd51   :  { %v3587_v62 = vadd.f32 %v1434_v29, %v1426_v61  ;;  %v3673_v29 = vld [vmem:[%s3764_s2] sm:$0xff] }
 0xd53   :  { %3035 = vtanh.f32 %v3587_v62  ;;  %v1700_v37 = vrot.slane %v3587_v62, 6 }
 0xd5d   :  { %v3034_v63 = vpop.eup %3033 }
 0xd5e   :  { %1341 = vrot.lane.b32.xlu0 %v3034_v63, %s3205_s13 }
 0xd60   :  { %v3036_v0 = vpop.eup %3035 }
 0xd61   :  { %1439 = vrot.lane.b32.xlu1 %v3036_v0, %s3205_s13 }
 0xdd0   :  { %v1342_v1 = vpop.permute.xlu0 %1341 }
 0xdd1   :  { %v1344_v3 = vmul.f32 %v3030_v42, %v1342_v1 }
 0xdd3   :  { %1444 = vrot.lane.b32.xlu0 %v1344_v3, %s3206_s4  ;;  %v1440_v4 = vpop.permute.xlu1 %1439 }
 0xdd4   :  { %v1442_v5 = vmul.f32 %v3032_v53, %v1440_v4 }
 0xdd6   :  { %1519 = vrot.lane.b32.xlu1 %v1442_v5, %s3206_s4 }
 0xe45   :  { %v1445_v6 = vpop.permute.xlu0 %1444 }
 0xe46   :  { %2840 = vmatmul.mubr.msk.f32.vlgmr.msra.gmra.mxu1 %vm219_vm1, %v1445_v6 }
 0xe47   :  { %2854 = vmatpush3.msra.mxu1 %v3293_v8  ;;  %2861 = vmatprep.mubr.msk.f32.mxu1 %vm3204_vm2, %v3203_v2 }
 0xe48   :  { %2855 = vmatprep.subr.mxu1 %v3203_v2  ;;  %v1520_v7 = vpop.permute.xlu1 %1519 }
 0xe49   :  { %2856 = vmatpush3.msra.mxu1 %v3299_v9  ;;  %2851 = vmatmul.mubr.msk.f32.vlgmr.msra.gmra.mxu0 %vm219_vm1, %v1520_v7 }
 0xe4a   :  { %2857 = vmatprep.subr.mxu1 %v3203_v2  ;;  %2865 = vmatpush3.msra.mxu0 %v3348_v43 }
 0xe4b   :  { %2858 = vmatpush3.msra.mxu1 %v3305_v11  ;;  %2866 = vmatprep.subr.mxu0 %v3203_v2 }
 0xe4c   :  { %2859 = vmatprep.subr.mxu1 %v3203_v2  ;;  %2867 = vmatpush3.msra.mxu0 %v3350_v44 }
 0xe4d   :  { %2860 = vmatpush3.msra.mxu1 %v3312_v13  ;;  %2868 = vmatprep.subr.mxu0 %v3203_v2 }
 0xe4e   :  { %2862 = vmatmul.mubr.msk.f32.vlgmr.msra.gmra.mxu1 %vm219_vm1, %v1520_v7  ;;  %2869 = vmatpush3.msra.mxu0 %v3356_v46 }
 0xe4f   :  { %2870 = vmatprep.subr.mxu0 %v3203_v2  ;;  %2875 = vmatprep.subr.mxu1 %v3203_v2 }
 0xe50   :  { %2871 = vmatpush3.msra.mxu0 %v3366_v49  ;;  %2872 = vmatprep.mubr.msk.f32.mxu0 %vm3204_vm2, %v3203_v2 }
 0xe51   :  { %2876 = vmatpush3.msra.mxu1 %v3353_v45  ;;  %2886 = vmatprep.subr.mxu0 %v3203_v2 }
 0xe52   :  { %2877 = vmatprep.subr.mxu1 %v3203_v2  ;;  %2883 = vmatprep.mubr.msk.f32.mxu1 %vm3204_vm2, %v3203_v2 }
 0xe53   :  { %2878 = vmatpush3.msra.mxu1 %v3359_v47 }
 0xe54   :  { %2879 = vmatprep.subr.mxu1 %v3203_v2 }
 0xe55   :  { %2880 = vmatpush3.msra.mxu1 %v3363_v48 }
 0xe56   :  { %2881 = vmatprep.subr.mxu1 %v3203_v2 }
 0xe57   :  { %2882 = vmatpush3.msra.mxu1 %v3376_v51 }
 0xe58   :  { %2897 = vmatprep.subr.mxu1 %v3203_v2 }
 0xf06   :  { %v1514_v8 = vpop.f32.mrf.mxu1 }
 0xf08   :  { %v2841_v9 = vpop.f32.mrf.mxu1 }
 0xf09   :  { %v1589_v11 = vpop.f32.mrf.mxu0 }
 0xf0a   :  { %v1590_v13 = vadd.f32 %v1589_v11, %v1514_v8 }
 0xf0b   :  { %v2852_v10 = vpop.f32.mrf.mxu0 }
 0xf0c   :  { %v1593_v12 = vadd.f32 %v3418_v59, %v1590_v13 }
 0xf0e   :  { %3037 = vtanh.f32 %v1593_v12  ;;  %v1684_v14 = vpop.f32.mrf.mxu1  ;;  %v2523_v20 = vmul.f32 -1.442695, %v1593_v12 }
 0xf0f   :  { %v1689_v15 = vrot.slane %v1684_v14, 6 }
 0xf10   :  { %v2863_v16 = vpop.f32.mrf.mxu1 }
 0xf11   :  { %v1691_v17 = vadd.f32 %v1689_v15, %v3334_v27 }
 0xf13   :  { %3039 = vtanh.f32 %v1691_v17  ;;  %v2525_v21 = vmul.f32 -1.442695, %v1691_v17 }
 0xf14   :  { %3041 = vpow2.f32 %v2523_v20 }
 0xf15   :  { %3043 = vpow2.f32 %v2525_v21 }
 0xf1b   :  { %v3038_v18 = vpop.eup %3037 }
 0xf1c   :  { %1603 = vrot.lane.b32.xlu0 %v3038_v18, %s3205_s13 }
 0xf20   :  { %v3040_v19 = vpop.eup %3039 }
 0xf21   :  { %1704 = vrot.lane.b32.xlu1 %v3040_v19, %s3205_s13  ;;  %v3042_v22 = vpop.eup %3041 }
 0xf22   :  { %v1597_v23 = vadd.f32 1.0, %v3042_v22  ;;  %v3044_v24 = vpop.eup %3043 }
 0xf23   :  { %v1695_v25 = vadd.f32 1.0, %v3044_v24 }
 0xf24   :  { %3045 = vrcp.f32 %v1597_v23 }
 0xf25   :  { %3047 = vrcp.f32 %v1695_v25 }
 0xf31   :  { %v3046_v26 = vpop.eup %3045 }
 0xf32   :  { %v3048_v31 = vpop.eup %3047  ;;  %v1601_v34 = vmul.f32 %v3046_v26, %v3584_v60  ;;  %v3665_v60 = vld [vmem:[%s3764_s2 + $0x8] sm:$0xff] }
 0xf33   :  { %v1702_v38 = vmul.f32 %v3048_v31, %v1700_v37  ;;  %v3106_v37 = vld [vmem:[#allocation5 + $0x10] sm:$0xff] }
 0xf8e   :  { %v1604_v28 = vpop.permute.xlu0 %1603 }
 0xf8f   :  { %v1606_v30 = vmul.f32 %v3046_v26, %v1604_v28 }
 0xf91   :  { %1608 = vrot.lane.b32.xlu0 %v1606_v30, %s3206_s4 }
 0xf93   :  { %v1705_v32 = vpop.permute.xlu1 %1704 }
 0xf94   :  { %v1707_v33 = vmul.f32 %v3048_v31, %v1705_v32  ;;  %v3101_v32 = vld [vmem:[#allocation7 + $0x18] sm:$0xff] }
 0xf96   :  { %1709 = vrot.lane.b32.xlu1 %v1707_v33, %s3206_s4  ;;  %v3102_v33 = vld [vmem:[#allocation7 + $0x10] sm:$0xff] }
0x1003   :  { %v1609_v35 = vpop.permute.xlu0 %1608 }
0x1004   :  { %v3634_v36 = vadd.f32 %v1609_v35, %v1601_v34  ;;  %v3103_v34 = vld [vmem:[#allocation7 + $0x8] sm:$0xff]  ;;  %v3104_v35 = vld [vmem:[#allocation7] sm:$0xff] }
0x1006   :  { %3049 = vtanh.f32 %v3634_v36 }
0x1008   :  { %v1710_v39 = vpop.permute.xlu1 %1709 }
0x1009   :  { %v3638_v40 = vadd.f32 %v1710_v39, %v1702_v38  ;;  %v3107_v38 = vld [vmem:[#allocation5 + $0x8] sm:$0xff]  ;;  %v3108_v39 = vld [vmem:[#allocation5] sm:$0xff] }
0x100b   :  { %3051 = vtanh.f32 %v3638_v40  ;;  %v1977_v14 = vrot.slane %v3638_v40, 6 }
0x1013   :  { %v3050_v41 = vpop.eup %3049 }
0x1014   :  { %1614 = vrot.lane.b32.xlu0 %v3050_v41, %s3205_s13 }
0x1018   :  { %v3052_v42 = vpop.eup %3051 }
0x1019   :  { %1715 = vrot.lane.b32.xlu1 %v3052_v42, %s3205_s13 }
0x1086   :  { %v1615_v50 = vpop.permute.xlu0 %1614 }
0x1087   :  { %v1617_v52 = vmul.f32 %v3046_v26, %v1615_v50 }
0x1089   :  { %1720 = vrot.lane.b32.xlu0 %v1617_v52, %s3206_s4 }
0x108b   :  { %v1716_v53 = vpop.permute.xlu1 %1715 }
0x108c   :  { %v1718_v54 = vmul.f32 %v3048_v31, %v1716_v53  ;;  %v3109_v53 = vld [vmem:[#allocation8] ss:$0 sm:$0xff] }
0x108e   :  { %v1795_v55 = vrot.slane %v1718_v54, 2 }
0x1090   :  { %1796 = vrot.lane.b32.xlu1 %v1795_v55, %s3206_s4 }
0x10fb   :  { %v1721_v56 = vpop.permute.xlu0 %1720 }
0x10fc   :  { %2873 = vmatmul.mubr.msk.f32.vlgmr.msra.gmra.mxu0 %vm219_vm1, %v1721_v56 }
0x10fd   :  { %2887 = vmatpush3.msra.mxu0 %v3649_v57  ;;  %2894 = vmatprep.mubr.msk.f32.mxu0 %vm3204_vm2, %v3203_v2 }
0x10fe   :  { %2888 = vmatprep.subr.mxu0 %v3203_v2 }
0x10ff   :  { %2889 = vmatpush3.msra.mxu0 %v3658_v58 }
0x1100   :  { %2890 = vmatprep.subr.mxu0 %v3203_v2 }
0x1101   :  { %2891 = vmatpush3.msra.mxu0 %v3665_v60 }
0x1102   :  { %v1797_v61 = vpop.permute.xlu1 %1796  ;;  %2892 = vmatprep.subr.mxu0 %v3203_v2 }
0x1103   :  { %2884 = vmatmul.mubr.msk.f32.vlgmr.msra.gmra.mxu1 %vm219_vm1, %v1797_v61  ;;  %2893 = vmatpush3.msra.mxu0 %v3673_v29 }
0x1104   :  { %2895 = vmatmul.mubr.msk.f32.vlgmr.msra.gmra.mxu0 %vm219_vm1, %v1797_v61  ;;  %2898 = vmatpush3.msra.mxu1 %v3348_v43 }
0x1105   :  { %2899 = vmatprep.subr.mxu1 %v3203_v2  ;;  %2908 = vmatprep.subr.mxu0 %v3203_v2 }
0x1106   :  { %2900 = vmatpush3.msra.mxu1 %v3350_v44  ;;  %2909 = vmatpush3.msra.mxu0 %v3353_v45 }
0x1107   :  { %2901 = vmatprep.subr.mxu1 %v3203_v2  ;;  %2910 = vmatprep.subr.mxu0 %v3203_v2 }
0x1108   :  { %2902 = vmatpush3.msra.mxu1 %v3356_v46  ;;  %2911 = vmatpush3.msra.mxu0 %v3359_v47 }
0x1109   :  { %2903 = vmatprep.subr.mxu1 %v3203_v2  ;;  %2905 = vmatprep.mubr.msk.f32.mxu1 %vm3204_vm2, %v3203_v2 }
0x110a   :  { %2904 = vmatpush3.msra.mxu1 %v3366_v49  ;;  %2912 = vmatprep.subr.mxu0 %v3203_v2 }
0x110b   :  { %2919 = vmatprep.subr.mxu1 %v3203_v2  ;;  %2913 = vmatpush3.msra.mxu0 %v3363_v48 }
0x110c   :  { %2914 = vmatprep.subr.mxu0 %v3203_v2  ;;  %2916 = vmatprep.mubr.msk.f32.mxu0 %vm3204_vm2, %v3203_v2 }
0x110d   :  { %2915 = vmatpush3.msra.mxu0 %v3376_v51 }
0x110e   :  { %2930 = vmatprep.subr.mxu0 %v3203_v2 }
0x11bc   :  { %v1790_v43 = vpop.f32.mrf.mxu0 }
0x11be   :  { %v2874_v44 = vpop.f32.mrf.mxu0 }
0x11c3   :  { %v1866_v45 = vpop.f32.mrf.mxu1 }
0x11c4   :  { %v1867_v46 = vadd.f32 %v1866_v45, %v1790_v43  ;;  %v1961_v47 = vpop.f32.mrf.mxu0 }
0x11c5   :  { %v1966_v49 = vrot.slane %v1961_v47, 4  ;;  %v2885_v62 = vpop.f32.mrf.mxu1 }
0x11c6   :  { %v1870_v63 = vadd.f32 %v3418_v59, %v1867_v46  ;;  %v2896_v0 = vpop.f32.mrf.mxu0 }
0x11c7   :  { %v1968_v48 = vadd.f32 %v1966_v49, %v3334_v27 }
0x11c8   :  { %3053 = vtanh.f32 %v1870_v63  ;;  %v2528_v51 = vmul.f32 -1.442695, %v1870_v63 }
0x11c9   :  { %3055 = vtanh.f32 %v1968_v48  ;;  %v2530_v4 = vmul.f32 -1.442695, %v1968_v48 }
0x11ca   :  { %3057 = vpow2.f32 %v2528_v51 }
0x11cb   :  { %3059 = vpow2.f32 %v2530_v4 }
0x11d5   :  { %v3054_v1 = vpop.eup %3053 }
0x11d6   :  { %v3056_v3 = vpop.eup %3055  ;;  %1880 = vrot.lane.b32.xlu0 %v3054_v1, %s3205_s13 }
0x11d7   :  { %1981 = vrot.lane.b32.xlu1 %v3056_v3, %s3205_s13  ;;  %v3058_v5 = vpop.eup %3057 }
0x11d8   :  { %v3060_v6 = vpop.eup %3059  ;;  %v1874_v7 = vadd.f32 1.0, %v3058_v5 }
0x11d9   :  { %v1972_v8 = vadd.f32 1.0, %v3060_v6 }
0x11da   :  { %3061 = vrcp.f32 %v1874_v7 }
0x11db   :  { %3063 = vrcp.f32 %v1972_v8 }
0x11e7   :  { %v3062_v59 = vpop.eup %3061 }
0x11e8   :  { %v3064_v11 = vpop.eup %3063  ;;  %v1878_v15 = vmul.f32 %v3062_v59, %v3634_v36  ;;  %v3105_v36 = vld [vmem:[#allocation5 + $0x18] sm:$0xff] }
0x11e9   :  { %v1979_v17 = vmul.f32 %v3064_v11, %v1977_v14 }
0x1248   :  { %v1881_v9 = vpop.permute.xlu0 %1880 }
0x1249   :  { %v1883_v13 = vmul.f32 %v3062_v59, %v1881_v9  ;;  %v1982_v10 = vpop.permute.xlu1 %1981 }
0x124a   :  { %v1984_v12 = vmul.f32 %v3064_v11, %v1982_v10 }
0x124b   :  { %1885 = vrot.lane.b32.xlu0 %v1883_v13, %s3206_s4 }
0x124c   :  { %1986 = vrot.lane.b32.xlu1 %v1984_v12, %s3206_s4 }
0x12bd   :  { %v1886_v16 = vpop.permute.xlu0 %1885 }
0x12be   :  { %v3706_v18 = vadd.f32 %v1886_v16, %v1878_v15  ;;  %v1987_v19 = vpop.permute.xlu1 %1986 }
0x12bf   :  { %v3708_v20 = vadd.f32 %v1987_v19, %v1979_v17 }
0x12c0   :  { %3065 = vtanh.f32 %v3706_v18 }
0x12c1   :  { %3067 = vtanh.f32 %v3708_v20  ;;  %v2254_v51 = vrot.slane %v3708_v20, 6 }
0x12cd   :  { %v3066_v21 = vpop.eup %3065 }
0x12ce   :  { %v3068_v22 = vpop.eup %3067  ;;  %1891 = vrot.lane.b32.xlu0 %v3066_v21, %s3205_s13 }
0x12cf   :  { %1992 = vrot.lane.b32.xlu1 %v3068_v22, %s3205_s13 }
0x1340   :  { %v1892_v23 = vpop.permute.xlu0 %1891 }
0x1341   :  { %v1894_v24 = vmul.f32 %v3062_v59, %v1892_v23  ;;  %v1993_v25 = vpop.permute.xlu1 %1992 }
0x1342   :  { %v1995_v26 = vmul.f32 %v3064_v11, %v1993_v25 }
0x1343   :  { %1997 = vrot.lane.b32.xlu0 %v1894_v24, %s3206_s4 }
0x1344   :  { %v2072_v28 = vrot.slane %v1995_v26, 4 }
0x1346   :  { %2073 = vrot.lane.b32.xlu1 %v2072_v28, %s3206_s4 }
0x13b5   :  { %v1998_v30 = vpop.permute.xlu0 %1997 }
0x13b6   :  { %2906 = vmatmul.mubr.msk.f32.vlgmr.msra.gmra.mxu1 %vm219_vm1, %v1998_v30  ;;  %v2539_v30 = vld [vmem:[%s3771_s9] ss:$0 sm:$0xff] }
0x13b7   :  { %2920 = vmatpush3.msra.mxu1 %v3649_v57  ;;  %2927 = vmatprep.mubr.msk.f32.mxu1 %vm3204_vm2, %v3203_v2 }
0x13b8   :  { %2921 = vmatprep.subr.mxu1 %v3203_v2  ;;  %v2074_v31 = vpop.permute.xlu1 %2073 }
0x13b9   :  { %2922 = vmatpush3.msra.mxu1 %v3658_v58  ;;  %2917 = vmatmul.mubr.msk.f32.vlgmr.msra.gmra.mxu0 %vm219_vm1, %v2074_v31 }
0x13ba   :  { %2923 = vmatprep.subr.mxu1 %v3203_v2  ;;  %2931 = vmatpush3.msra.mxu0 %v3101_v32 }
0x13bb   :  { %2924 = vmatpush3.msra.mxu1 %v3665_v60  ;;  %2932 = vmatprep.subr.mxu0 %v3203_v2 }
0x13bc   :  { %2925 = vmatprep.subr.mxu1 %v3203_v2  ;;  %2933 = vmatpush3.msra.mxu0 %v3102_v33 }
0x13bd   :  { %2926 = vmatpush3.msra.mxu1 %v3673_v29  ;;  %2934 = vmatprep.subr.mxu0 %v3203_v2 }
0x13be   :  { %2928 = vmatmul.mubr.msk.f32.vlgmr.msra.gmra.mxu1 %vm219_vm1, %v2074_v31  ;;  %2935 = vmatpush3.msra.mxu0 %v3103_v34 }
0x13bf   :  { %2936 = vmatprep.subr.mxu0 %v3203_v2  ;;  %2941 = vmatprep.subr.mxu1 %v3203_v2 }
0x13c0   :  { %2937 = vmatpush3.msra.mxu0 %v3104_v35  ;;  %2938 = vmatprep.mubr.msk.f32.mxu0 %vm3204_vm2, %v3203_v2 }
0x13c1   :  { %2942 = vmatpush3.msra.mxu1 %v3105_v36  ;;  %2949 = vmatprep.mubr.msk.f32.mxu1 %vm3204_vm2, %v3203_v2 }
0x13c2   :  { %2943 = vmatprep.subr.mxu1 %v3203_v2 }
0x13c3   :  { %2944 = vmatpush3.msra.mxu1 %v3106_v37 }
0x13c4   :  { %2945 = vmatprep.subr.mxu1 %v3203_v2 }
0x13c5   :  { %2946 = vmatpush3.msra.mxu1 %v3107_v38 }
0x13c6   :  { %2947 = vmatprep.subr.mxu1 %v3203_v2 }
0x13c7   :  { %2948 = vmatpush3.msra.mxu1 %v3108_v39 }
0x1476   :  { %v2067_v40 = vpop.f32.mrf.mxu1 }
0x1478   :  { %v2907_v41 = vpop.f32.mrf.mxu1 }
0x1479   :  { %v2143_v42 = vpop.f32.mrf.mxu0  ;;  %v2540_v41 = vld [vmem:[#allocation2] ss:$0 sm:$0xff] }
0x147a   :  { %v2144_v50 = vadd.f32 %v2143_v42, %v2067_v40 }
0x147b   :  { %v2918_v52 = vpop.f32.mrf.mxu0 }
0x147c   :  { %v2147_v54 = vadd.f32 %v3109_v53, %v2144_v50 }
0x147e   :  { %3069 = vtanh.f32 %v2147_v54  ;;  %v2238_v55 = vpop.f32.mrf.mxu1  ;;  %v2533_v61 = vmul.f32 -1.442695, %v2147_v54 }
0x147f   :  { %v2243_v56 = vrot.slane %v2238_v55, 2 }
0x1480   :  { %v2929_v57 = vpop.f32.mrf.mxu1 }
0x1481   :  { %v2245_v58 = vadd.f32 %v2243_v56, %v3334_v27 }
0x1483   :  { %3071 = vtanh.f32 %v2245_v58  ;;  %v2535_v29 = vmul.f32 -1.442695, %v2245_v58 }
0x1484   :  { %3073 = vpow2.f32 %v2533_v61 }
0x1485   :  { %3075 = vpow2.f32 %v2535_v29 }
0x148b   :  { %v3070_v60 = vpop.eup %3069 }
0x148c   :  { %2157 = vrot.lane.b32.xlu1 %v3070_v60, %s3205_s13 }
0x1490   :  { %v3072_v2 = vpop.eup %3071 }
0x1491   :  { %2258 = vrot.lane.b32.xlu0 %v3072_v2, %s3205_s13  ;;  %v3074_v43 = vpop.eup %3073 }
0x1492   :  { %v2151_v44 = vadd.f32 1.0, %v3074_v43  ;;  %v3076_v45 = vpop.eup %3075 }
0x1493   :  { %v2249_v46 = vadd.f32 1.0, %v3076_v45 }
0x1494   :  { %3077 = vrcp.f32 %v2151_v44 }
0x1495   :  { %3079 = vrcp.f32 %v2249_v46 }
0x14a1   :  { %v3078_v47 = vpop.eup %3077 }
0x14a2   :  { %v3080_v62 = vpop.eup %3079  ;;  %v2155_v48 = vmul.f32 %v3078_v47, %v3706_v18 }
0x14a3   :  { %v2256_v4 = vmul.f32 %v3080_v62, %v2254_v51 }
0x14fe   :  { %v2158_v49 = vpop.permute.xlu1 %2157 }
0x14ff   :  { %v2160_v27 = vmul.f32 %v3078_v47, %v2158_v49 }
0x1501   :  { %2162 = vrot.lane.b32.xlu1 %v2160_v27, %s3206_s4 }
0x1503   :  { %v2259_v63 = vpop.permute.xlu0 %2258 }
0x1504   :  { %v2261_v0 = vmul.f32 %v3080_v62, %v2259_v63 }
0x1506   :  { %2263 = vrot.lane.b32.xlu0 %v2261_v0, %s3206_s4 }
0x1573   :  { %v2163_v1 = vpop.permute.xlu1 %2162 }
0x1574   :  { %v2165_v3 = vadd.f32 %v2163_v1, %v2155_v48 }
0x1576   :  { %3081 = vtanh.f32 %v2165_v3 }
0x1578   :  { %v2264_v5 = vpop.permute.xlu0 %2263 }
0x1579   :  { %v2266_v6 = vadd.f32 %v2264_v5, %v2256_v4 }
0x157b   :  { %3083 = vtanh.f32 %v2266_v6 }
0x1583   :  { %v3082_v7 = vpop.eup %3081 }
0x1584   :  { %2168 = vrot.lane.b32.xlu1 %v3082_v7, %s3205_s13 }
0x1588   :  { %v3084_v8 = vpop.eup %3083 }
0x1589   :  { %2269 = vrot.lane.b32.xlu0 %v3084_v8, %s3205_s13 }
0x15f6   :  { %v2169_v59 = vpop.permute.xlu1 %2168 }
0x15f7   :  { %v2171_v9 = vmul.f32 %v3078_v47, %v2169_v59 }
0x15f9   :  { %2274 = vrot.lane.b32.xlu0 %v2171_v9, %s3206_s4 }
0x15fb   :  { %v2270_v11 = vpop.permute.xlu0 %2269 }
0x15fc   :  { %v2272_v13 = vmul.f32 %v3080_v62, %v2270_v11 }
0x15fe   :  { %v2349_v10 = vrot.slane %v2272_v13, 6 }
0x1600   :  { %2350 = vrot.lane.b32.xlu1 %v2349_v10, %s3206_s4 }
0x166b   :  { %v2275_v12 = vpop.permute.xlu0 %2274 }
0x166c   :  { %2939 = vmatmul.mubr.msk.f32.vlgmr.msra.gmra.mxu0 %vm219_vm1, %v2275_v12 }
0x1672   :  { %v2351_v14 = vpop.permute.xlu1 %2350 }
0x1673   :  { %2950 = vmatmul.mubr.msk.f32.vlgmr.msra.gmra.mxu1 %vm219_vm1, %v2351_v14 }
0x172c   :  { %v2344_v15 = vpop.f32.mrf.mxu0 }
0x172e   :  { %v2940_v16 = vpop.f32.mrf.mxu0 }
0x1733   :  { %v2420_v17 = vpop.f32.mrf.mxu1 }
0x1734   :  { %v2421_v18 = vadd.f32 %v2420_v17, %v2344_v15 }
0x1735   :  { %v2951_v19 = vpop.f32.mrf.mxu1 }
0x1736   :  { %v2424_v20 = vadd.f32 %v3109_v53, %v2421_v18 }
0x1738   :  { %3085 = vtanh.f32 %v2424_v20  ;;  %v2538_v22 = vmul.f32 -1.442695, %v2424_v20 }
0x173a   :  { %3087 = vpow2.f32 %v2538_v22 }
0x1745   :  { %v3086_v21 = vpop.eup %3085 }
0x1746   :  { %2434 = vrot.lane.b32.xlu0 %v3086_v21, %s3205_s13 }
0x1747   :  { %v3088_v23 = vpop.eup %3087 }
0x1748   :  { %v2428_v24 = vadd.f32 1.0, %v3088_v23 }
0x174a   :  { %3089 = vrcp.f32 %v2428_v24 }
0x1757   :  { %v3090_v25 = vpop.eup %3089 }
0x1758   :  { %v2432_v31 = vmul.f32 %v3090_v25, %v2165_v3 }
0x17b8   :  { %v2435_v26 = vpop.permute.xlu0 %2434 }
0x17b9   :  { %v2437_v28 = vmul.f32 %v3090_v25, %v2435_v26 }
0x17bb   :  { %2439 = vrot.lane.b32.xlu1 %v2437_v28, %s3206_s4 }
0x17bf   :  { %2455 = vrot.lane.b32.xlu1 %v2539_v30, %s3207_s23 }
0x182d   :  { %v2440_v32 = vpop.permute.xlu1 %2439 }
0x182e   :  { %v2442_v33 = vadd.f32 %v2440_v32, %v2432_v31 }
0x1830   :  { %3091 = vtanh.f32 %v2442_v33 }
0x1831   :  { %v2456_v36 = vpop.permute.xlu1 %2455 }
0x183d   :  { %v3092_v34 = vpop.eup %3091 }
0x183e   :  { %2445 = vrot.lane.b32.xlu0 %v3092_v34, %s3205_s13 }
0x18b0   :  { %v2446_v35 = vpop.permute.xlu0 %2445 }
0x18b1   :  { %v2448_v37 = vmul.f32 %v3090_v25, %v2446_v35 }
0x18b3   :  { %v2458_v38 = vmul.f32 %v2456_v36, %v2448_v37 }
0x18b5   :  { %2460 = vrot.lane.b32.xlu0 %v2458_v38, %s3206_s4 }
0x1927   :  { %v2461_v39 = vpop.permute.xlu0 %2460 }
0x1928   :  { %v2464_v40 = vsel %vm2463_vm6, %v2461_v39, 0.0 }
0x1929   :  { %2465 = vadd.xlane.f32.xlu1 %v2464_v40 }
0x19b2   :  { %v2466_v42 = vpop.xlane.xlu1 %2465 }
0x19b3   :  { %v2474_v50 = vadd.f32 %v2540_v41, %v2466_v42 }
0x19b5   :  { %v2541_v52 = vmul.f32 -1.442695, %v2474_v50 }
0x19b7   :  { %3093 = vpow2.f32 %v2541_v52 }
0x19c4   :  { %v3094_v53 = vpop.eup %3093 }
0x19c5   :  { %v2478_v54 = vadd.f32 1.0, %v3094_v53 }
0x19c7   :  { %3095 = vrcp.f32 %v2478_v54 }
0x19d4   :  { %v3096_v55 = vpop.eup %3095 }
0x19d5   :  { %2482 = vst.msk [vmem:[%s3773_s11] sm:$0x3] %vm2481_vm7, %v3096_v55 }
0x19d6   :  { %2487 = vsyncpa [#allocation4], 1 }
0x19d7   :  { %2488 = vsyncpa [#allocation6], 1 }
0x19d8   :  { %2489 = vsyncpa [#allocation9], 1 }

</bundles_post_ra>
